<compile_context>
chip_gen: v6e
topology: v6e:2x2x1
jax: 0.10.0
libtpu: 0.0.40
codegen_flags: <defaults>
</compile_context>

<pallas_src>
import jax
import jax.numpy as jnp
from jax.experimental import pallas as pl
from jax.experimental.pallas import tpu as pltpu

# ----- Koopman_SUBNET hyper-parameters (small, consistent with the module) -----
NU, NY, NX = 2, 2, 8          # input / output / state sizes
NB, NA = 4, 4                 # past-input / past-output window lengths
HID = 32                      # MLP_res_net hidden width (2 hidden layers, tanh)
B, T = 2, 8                   # batch, future horizon


# --------------------------------- Pallas kernel ---------------------------------
def _mlp_block(z, rw, rb, w1, b1, w2, b2, w3, b3):
    """MLP_res_net on refs: Linear(z) + W3·tanh(W2·tanh(W1·z + b1) + b2) + b3."""
    res = jnp.dot(z, rw[...], preferred_element_type=jnp.float32) + rb[...]
    a1 = jnp.tanh(jnp.dot(z, w1[...], preferred_element_type=jnp.float32) + b1[...])
    a2 = jnp.tanh(jnp.dot(a1, w2[...], preferred_element_type=jnp.float32) + b2[...])
    return res + jnp.dot(a2, w3[...], preferred_element_type=jnp.float32) + b3[...]


def koopman_kernel(
    enc_in_ref, uexp_ref,
    e_rw, e_rb, e_w1, e_b1, e_w2, e_b2, e_w3, e_b3,
    wx_ref, b_rb, b_b1, b_w2, b_b2, b_w3, b_b3,
    ct_ref,
    out_ref, xfut_scr,
):
    bpad = enc_in_ref.shape[0]
    n_steps = uexp_ref.shape[0]
    nx = wx_ref.shape[0]
    nxnu = b_rb.shape[-1]
    hid = b_b1.shape[-1]
    nu = nxnu // nx

    # ---- encoder (one shot): x0 = MLP_res_net(concat(flat(upast), flat(ypast))) ----
    x = _mlp_block(enc_in_ref[...], e_rw, e_rb, e_w1, e_b1, e_w2, e_b2, e_w3, e_b3)

    # ---- hoist loop-invariant weight loads and bias broadcasts (no per-step re-issue) ----
    wx = wx_ref[...]                                   # (nx, nx + nx*nu + hid) = [A.T | rw | w1]
    w2 = b_w2[...]
    w3 = b_w3[...]
    rb_b = jnp.broadcast_to(b_rb[...], (bpad, nxnu))
    b1_b = jnp.broadcast_to(b_b1[...], (bpad, hid))
    b2_b = jnp.broadcast_to(b_b2[...], (bpad, hid))
    b3_b = jnp.broadcast_to(b_b3[...], (bpad, nxnu))

    # ---- serial Koopman recurrence, fully unrolled (T static & small) ----
    for t in range(n_steps):
        xfut_scr[t] = x                                # stash x_t ; y_t = C@x_t applied after loop
        zf = jnp.dot(x, wx, preferred_element_type=jnp.float32)   # one fused MXU push per step
        ax = zf[:, :nx]                                # x @ A.T
        res = zf[:, nx:nx + nxnu] + rb_b               # Bnet residual branch (column-permuted)
        a1 = jnp.tanh(zf[:, nx + nxnu:] + b1_b)        # tanh(x @ W1 + b1)
        a2 = jnp.tanh(jnp.dot(a1, w2, preferred_element_type=jnp.float32) + b2_b)
        bflat = res + jnp.dot(a2, w3, preferred_element_type=jnp.float32) + b3_b   # (bpad, nu*nx)
        prod = bflat * uexp_ref[t]                     # B(x)_{i,j} * u_j, column-major groups
        bu = prod[:, :nx]
        for j in range(1, nu):
            bu = bu + prod[:, j * nx:(j + 1) * nx]     # fold over nu  ->  B(x_t) @ u_t
        x = ax + bu                                    # x_{t+1} = A @ x_t + B(x_t) @ u_t

    # ---- batched output map y_t = C @ x_t for all (t, b) at once; single store ----
    x_all = xfut_scr[...].reshape(n_steps * bpad, nx)
    out_ref[...] = jnp.dot(x_all, ct_ref[...], preferred_element_type=jnp.float32)


# --------------------------------- wrapper (glue) ---------------------------------
def koopman_forward(upast, ypast, ufuture, params):
    enc_p, A, bnet_p, C = params
    b = upast.shape[0]
    t_len = ufuture.shape[1]
    bpad = max(8, -(-b // 8) * 8)                      # pad batch to a full sublane group

    # encoder input: flatten + concat past windows (MLP_res_net flattens from dim 1)
    enc_in = jnp.concatenate(
        [upast.reshape(b, -1), ypast.reshape(b, -1)], axis=-1).astype(jnp.float32)
    enc_in = jnp.pad(enc_in, ((0, bpad - b), (0, 0)))

    # TODO(synk): (ufuture - umean)/ustd uses dataset stats -> identity here.
    ufut_tm = jnp.swapaxes(ufuture, 0, 1).astype(jnp.float32)       # (T, B, nu) time-major
    ufut_tm = jnp.pad(ufut_tm, ((0, 0), (0, bpad - b), (0, 0)))
    # expand u so uexp[t, b, j*nx + i] == u[t, b, j]   (matches permuted Bnet columns)
    uexp = jnp.repeat(ufut_tm, NX, axis=-1)                         # (T, Bpad, nu*nx)

    # Bnet output-column permutation: row-major (nx, nu) view -> column-major (nu, nx) groups
    b_rw, b_rb, b_w1, b_b1, b_w2, b_b2, b_w3, b_b3 = bnet_p
    perm = [i * NU + j for j in range(NU) for i in range(NX)]
    b_rw_p, b_rb_p = b_rw[:, perm], b_rb[:, perm]
    b_w3_p, b_b3_p = b_w3[:, perm], b_b3[:, perm]

    # fuse the x-side weights of the recurrence into one matrix: [A.T | rw | w1]
    wx = jnp.concatenate([A.T, b_rw_p, b_w1], axis=1)               # (nx, nx + nx*nu + hid)
    ct = C.T                                                        # (nx, ny)

    inputs = (enc_in, uexp, *enc_p, wx, b_rb_p, b_b1, b_w2, b_b2, b_w3_p, b_b3_p, ct)

    out_flat = pl.pallas_call(
        koopman_kernel,
        out_shape=jax.ShapeDtypeStruct((t_len * bpad, NY), jnp.float32),
        in_specs=[pl.BlockSpec(memory_space=pltpu.MemorySpace.VMEM)] * len(inputs),
        out_specs=pl.BlockSpec(memory_space=pltpu.MemorySpace.VMEM),
        scratch_shapes=[pltpu.VMEM((t_len, bpad, NX), jnp.float32)],
    )(*inputs)

    # TODO(synk): y*ystd + ymean uses dataset stats -> identity here.
    out = out_flat.reshape(t_len, bpad, NY)[:, :b]                  # drop batch padding
    return jnp.swapaxes(out, 0, 1)                                  # (B, T, ny)


# ------------------------------ deterministic parameters ------------------------------
def mlp_res_params(key, d_in, d_out, hid=HID, scale=0.1):
    ks = jax.random.split(key, 4)

    def lin(k, di, do):
        kw, kb = jax.random.split(k)
        w = jax.random.normal(kw, (di, do), jnp.float32) * (scale / jnp.sqrt(di))
        bia = jax.random.normal(kb, (1, do), jnp.float32) * scale
        return w, bia

    rw, rb = lin(ks[0], d_in, d_out)
    w1, b1 = lin(ks[1], d_in, hid)
    w2, b2 = lin(ks[2], hid, hid)
    w3, b3 = lin(ks[3], hid, d_out)
    return (rw, rb, w1, b1, w2, b2, w3, b3)


# ------------------------------ pure-JAX reference ------------------------------
def _mlp_res_apply(params, *args):
    rw, rb, w1, b1, w2, b2, w3, b3 = params
    z = jnp.concatenate([a.reshape(a.shape[0], -1) for a in args], axis=-1)
    res = z @ rw + rb
    a1 = jnp.tanh(z @ w1 + b1)
    a2 = jnp.tanh(a1 @ w2 + b2)
    return res + a2 @ w3 + b3


def koopman_forward_ref(upast, ypast, ufuture, params):
    """Direct transcription of Koopman_SUBNET.forward (Norm treated as identity)."""
    enc_p, A, bnet_p, C = params
    b = upast.shape[0]
    x = _mlp_res_apply(enc_p, upast, ypast)                  # (B, nx)
    ys = []
    for t in range(ufuture.shape[1]):
        u = ufuture[:, t]                                    # (B, nu)
        ys.append(x @ C.T)                                   # y_t = C @ x_t   (feedthrough=False)
        Bmat = _mlp_res_apply(bnet_p, x).reshape(b, NX, NU)  # Matrix_converter (row-major view)
        x = x @ A.T + jnp.einsum('bij,bj->bi', Bmat, u)      # x_{t+1} = A@x_t + B(x_t)@u_t
    return jnp.stack(ys, axis=1)                             # (B, T, ny)


# -------------------------------------- main --------------------------------------
if __name__ == "__main__":
    key = jax.random.PRNGKey(0)
    kparams, kdata = jax.random.split(key)
    ke, kbn, ka, kc = jax.random.split(kparams, 4)

    enc_p = mlp_res_params(ke, NB * NU + NA * NY, NX)   # encoder: [(nb,nu),(na,ny)] -> nx
    bnet_p = mlp_res_params(kbn, NX, NX * NU)           # Bnet: nx -> nx*nu  (B_depends_on_u=False)
    A = jax.random.normal(ka, (NX, NX), jnp.float32) / (2.0 * NX ** 0.5)
    C = jax.random.normal(kc, (NY, NX), jnp.float32) / (2.0 * NX ** 0.5)
    params = (enc_p, A, bnet_p, C)

    k1, k2, k3 = jax.random.split(kdata, 3)
    upast = jax.random.normal(k1, (B, NB, NU), jnp.float32)
    ypast = jax.random.normal(k2, (B, NA, NY), jnp.float32)
    ufuture = jax.random.normal(k3, (B, T, NU), jnp.float32)

    out = koopman_forward(upast, ypast, ufuture, params)
    out = jax.block_until_ready(out)

    ref = koopman_forward_ref(upast, ypast, ufuture, params)
    assert out.shape == (B, T, NY), out.shape
    assert bool(jnp.all(jnp.isfinite(out)))
    max_err = float(jnp.max(jnp.abs(out - ref)))
    assert bool(jnp.allclose(out, ref, atol=2e-3, rtol=2e-3)), max_err

    print("KERNEL_OK")
</pallas_src>

<mosaic_0001>
module attributes {stable_mosaic.version = 11 : i64} {
  func.func @koopman_kernel(%arg0: memref<8x16xf32, #tpu.memory_space<vmem>>, %arg1: memref<8x8x16xf32, #tpu.memory_space<vmem>>, %arg2: memref<16x8xf32, #tpu.memory_space<vmem>>, %arg3: memref<1x8xf32, #tpu.memory_space<vmem>>, %arg4: memref<16x32xf32, #tpu.memory_space<vmem>>, %arg5: memref<1x32xf32, #tpu.memory_space<vmem>>, %arg6: memref<32x32xf32, #tpu.memory_space<vmem>>, %arg7: memref<1x32xf32, #tpu.memory_space<vmem>>, %arg8: memref<32x8xf32, #tpu.memory_space<vmem>>, %arg9: memref<1x8xf32, #tpu.memory_space<vmem>>, %arg10: memref<8x56xf32, #tpu.memory_space<vmem>>, %arg11: memref<1x16xf32, #tpu.memory_space<vmem>>, %arg12: memref<1x32xf32, #tpu.memory_space<vmem>>, %arg13: memref<32x32xf32, #tpu.memory_space<vmem>>, %arg14: memref<1x32xf32, #tpu.memory_space<vmem>>, %arg15: memref<32x16xf32, #tpu.memory_space<vmem>>, %arg16: memref<1x16xf32, #tpu.memory_space<vmem>>, %arg17: memref<8x2xf32, #tpu.memory_space<vmem>>, %arg18: memref<64x2xf32, #tpu.memory_space<vmem>>, %arg19: memref<8x8x8xf32, #tpu.memory_space<vmem>>) attributes {dimension_semantics = [], scalar_prefetch = 0 : i64, scratch_operands = 1 : i64, tpu.core_type = #tpu.core_type<tc>} {
    %c0 = arith.constant 0 : index
    %c0_0 = arith.constant 0 : index
    %0 = vector.load %arg0[%c0, %c0_0] : memref<8x16xf32, #tpu.memory_space<vmem>>, vector<8x16xf32>
    %c0_1 = arith.constant 0 : index
    %c0_2 = arith.constant 0 : index
    %1 = vector.load %arg2[%c0_1, %c0_2] : memref<16x8xf32, #tpu.memory_space<vmem>>, vector<16x8xf32>
    %cst = arith.constant dense<0.000000e+00> : vector<8x8xf32>
    %2 = tpu.matmul %0, %1, %cst {dimension_numbers = #tpu.dot_dimension_numbers<[1], [0], [0], [1], [0, 0, 1, 1], [], []>} : vector<8x16xf32>, vector<16x8xf32>, vector<8x8xf32> -> vector<8x8xf32>
    %c0_3 = arith.constant 0 : index
    %c0_4 = arith.constant 0 : index
    %3 = vector.load %arg3[%c0_3, %c0_4] : memref<1x8xf32, #tpu.memory_space<vmem>>, vector<1x8xf32>
    %4 = vector.broadcast %3 : vector<1x8xf32> to vector<8x8xf32>
    %5 = arith.addf %2, %4 : vector<8x8xf32>
    %c0_5 = arith.constant 0 : index
    %c0_6 = arith.constant 0 : index
    %6 = vector.load %arg4[%c0_5, %c0_6] : memref<16x32xf32, #tpu.memory_space<vmem>>, vector<16x32xf32>
    %cst_7 = arith.constant dense<0.000000e+00> : vector<8x32xf32>
    %7 = tpu.matmul %0, %6, %cst_7 {dimension_numbers = #tpu.dot_dimension_numbers<[1], [0], [0], [1], [0, 0, 1, 1], [], []>} : vector<8x16xf32>, vector<16x32xf32>, vector<8x32xf32> -> vector<8x32xf32>
    %c0_8 = arith.constant 0 : index
    %c0_9 = arith.constant 0 : index
    %8 = vector.load %arg5[%c0_8, %c0_9] : memref<1x32xf32, #tpu.memory_space<vmem>>, vector<1x32xf32>
    %9 = vector.broadcast %8 : vector<1x32xf32> to vector<8x32xf32>
    %10 = arith.addf %7, %9 : vector<8x32xf32>
    %11 = math.tanh %10 : vector<8x32xf32>
    %c0_10 = arith.constant 0 : index
    %c0_11 = arith.constant 0 : index
    %12 = vector.load %arg6[%c0_10, %c0_11] : memref<32x32xf32, #tpu.memory_space<vmem>>, vector<32x32xf32>
    %cst_12 = arith.constant dense<0.000000e+00> : vector<8x32xf32>
    %13 = tpu.matmul %11, %12, %cst_12 {dimension_numbers = #tpu.dot_dimension_numbers<[1], [0], [0], [1], [0, 0, 1, 1], [], []>} : vector<8x32xf32>, vector<32x32xf32>, vector<8x32xf32> -> vector<8x32xf32>
    %c0_13 = arith.constant 0 : index
    %c0_14 = arith.constant 0 : index
    %14 = vector.load %arg7[%c0_13, %c0_14] : memref<1x32xf32, #tpu.memory_space<vmem>>, vector<1x32xf32>
    %15 = vector.broadcast %14 : vector<1x32xf32> to vector<8x32xf32>
    %16 = arith.addf %13, %15 : vector<8x32xf32>
    %17 = math.tanh %16 : vector<8x32xf32>
    %c0_15 = arith.constant 0 : index
    %c0_16 = arith.constant 0 : index
    %18 = vector.load %arg8[%c0_15, %c0_16] : memref<32x8xf32, #tpu.memory_space<vmem>>, vector<32x8xf32>
    %cst_17 = arith.constant dense<0.000000e+00> : vector<8x8xf32>
    %19 = tpu.matmul %17, %18, %cst_17 {dimension_numbers = #tpu.dot_dimension_numbers<[1], [0], [0], [1], [0, 0, 1, 1], [], []>} : vector<8x32xf32>, vector<32x8xf32>, vector<8x8xf32> -> vector<8x8xf32>
    %20 = arith.addf %5, %19 : vector<8x8xf32>
    %c0_18 = arith.constant 0 : index
    %c0_19 = arith.constant 0 : index
    %21 = vector.load %arg9[%c0_18, %c0_19] : memref<1x8xf32, #tpu.memory_space<vmem>>, vector<1x8xf32>
    %22 = vector.broadcast %21 : vector<1x8xf32> to vector<8x8xf32>
    %23 = arith.addf %20, %22 : vector<8x8xf32>
    %c0_20 = arith.constant 0 : index
    %c0_21 = arith.constant 0 : index
    %24 = vector.load %arg10[%c0_20, %c0_21] : memref<8x56xf32, #tpu.memory_space<vmem>>, vector<8x56xf32>
    %c0_22 = arith.constant 0 : index
    %c0_23 = arith.constant 0 : index
    %25 = vector.load %arg13[%c0_22, %c0_23] : memref<32x32xf32, #tpu.memory_space<vmem>>, vector<32x32xf32>
    %c0_24 = arith.constant 0 : index
    %c0_25 = arith.constant 0 : index
    %26 = vector.load %arg15[%c0_24, %c0_25] : memref<32x16xf32, #tpu.memory_space<vmem>>, vector<32x16xf32>
    %c0_26 = arith.constant 0 : index
    %c0_27 = arith.constant 0 : index
    %27 = vector.load %arg11[%c0_26, %c0_27] : memref<1x16xf32, #tpu.memory_space<vmem>>, vector<1x16xf32>
    %28 = vector.shape_cast %27 : vector<1x16xf32> to vector<1x16xf32>
    %29 = vector.broadcast %28 : vector<1x16xf32> to vector<8x16xf32>
    %c0_28 = arith.constant 0 : index
    %c0_29 = arith.constant 0 : index
    %30 = vector.load %arg12[%c0_28, %c0_29] : memref<1x32xf32, #tpu.memory_space<vmem>>, vector<1x32xf32>
    %31 = vector.shape_cast %30 : vector<1x32xf32> to vector<1x32xf32>
    %32 = vector.broadcast %31 : vector<1x32xf32> to vector<8x32xf32>
    %c0_30 = arith.constant 0 : index
    %c0_31 = arith.constant 0 : index
    %33 = vector.load %arg14[%c0_30, %c0_31] : memref<1x32xf32, #tpu.memory_space<vmem>>, vector<1x32xf32>
    %34 = vector.shape_cast %33 : vector<1x32xf32> to vector<1x32xf32>
    %35 = vector.broadcast %34 : vector<1x32xf32> to vector<8x32xf32>
    %c0_32 = arith.constant 0 : index
    %c0_33 = arith.constant 0 : index
    %36 = vector.load %arg16[%c0_32, %c0_33] : memref<1x16xf32, #tpu.memory_space<vmem>>, vector<1x16xf32>
    %37 = vector.shape_cast %36 : vector<1x16xf32> to vector<1x16xf32>
    %38 = vector.broadcast %37 : vector<1x16xf32> to vector<8x16xf32>
    %c0_34 = arith.constant 0 : index
    %c0_35 = arith.constant 0 : index
    %c0_36 = arith.constant 0 : index
    %39 = vector.load %arg19[%c0_34, %c0_35, %c0_36] : memref<8x8x8xf32, #tpu.memory_space<vmem>>, vector<1x8x8xf32>
    %40 = vector.shape_cast %39 : vector<1x8x8xf32> to vector<8x8xf32>
    %41 = vector.shape_cast %23 : vector<8x8xf32> to vector<1x8x8xf32>
    tpu.vector_store %arg19[%c0_34, %c0_35, %c0_36], %41 {strides = array<i32>} : memref<8x8x8xf32, #tpu.memory_space<vmem>>, vector<1x8x8xf32>,
    %cst_37 = arith.constant dense<0.000000e+00> : vector<8x56xf32>
    %42 = tpu.matmul %23, %24, %cst_37 {dimension_numbers = #tpu.dot_dimension_numbers<[1], [0], [0], [1], [0, 0, 1, 1], [], []>} : vector<8x8xf32>, vector<8x56xf32>, vector<8x56xf32> -> vector<8x56xf32>
    %43 = vector.extract_strided_slice %42 {offsets = [0, 0], sizes = [8, 8], strides = [1, 1]} : vector<8x56xf32> to vector<8x8xf32>
    %44 = vector.extract_strided_slice %42 {offsets = [0, 8], sizes = [8, 16], strides = [1, 1]} : vector<8x56xf32> to vector<8x16xf32>
    %45 = arith.addf %44, %29 : vector<8x16xf32>
    %46 = vector.extract_strided_slice %42 {offsets = [0, 24], sizes = [8, 32], strides = [1, 1]} : vector<8x56xf32> to vector<8x32xf32>
    %47 = arith.addf %46, %32 : vector<8x32xf32>
    %48 = math.tanh %47 : vector<8x32xf32>
    %cst_38 = arith.constant dense<0.000000e+00> : vector<8x32xf32>
    %49 = tpu.matmul %48, %25, %cst_38 {dimension_numbers = #tpu.dot_dimension_numbers<[1], [0], [0], [1], [0, 0, 1, 1], [], []>} : vector<8x32xf32>, vector<32x32xf32>, vector<8x32xf32> -> vector<8x32xf32>
    %50 = arith.addf %49, %35 : vector<8x32xf32>
    %51 = math.tanh %50 : vector<8x32xf32>
    %cst_39 = arith.constant dense<0.000000e+00> : vector<8x16xf32>
    %52 = tpu.matmul %51, %26, %cst_39 {dimension_numbers = #tpu.dot_dimension_numbers<[1], [0], [0], [1], [0, 0, 1, 1], [], []>} : vector<8x32xf32>, vector<32x16xf32>, vector<8x16xf32> -> vector<8x16xf32>
    %53 = arith.addf %45, %52 : vector<8x16xf32>
    %54 = arith.addf %53, %38 : vector<8x16xf32>
    %c0_40 = arith.constant 0 : index
    %c0_41 = arith.constant 0 : index
    %c0_42 = arith.constant 0 : index
    %55 = vector.load %arg1[%c0_40, %c0_41, %c0_42] : memref<8x8x16xf32, #tpu.memory_space<vmem>>, vector<1x8x16xf32>
    %56 = vector.shape_cast %55 : vector<1x8x16xf32> to vector<8x16xf32>
    %57 = arith.mulf %54, %56 : vector<8x16xf32>
    %58 = vector.extract_strided_slice %57 {offsets = [0, 0], sizes = [8, 8], strides = [1, 1]} : vector<8x16xf32> to vector<8x8xf32>
    %59 = vector.extract_strided_slice %57 {offsets = [0, 8], sizes = [8, 8], strides = [1, 1]} : vector<8x16xf32> to vector<8x8xf32>
    %60 = arith.addf %58, %59 : vector<8x8xf32>
    %61 = arith.addf %43, %60 : vector<8x8xf32>
    %c1 = arith.constant 1 : index
    %c0_43 = arith.constant 0 : index
    %c0_44 = arith.constant 0 : index
    %62 = vector.load %arg19[%c1, %c0_43, %c0_44] : memref<8x8x8xf32, #tpu.memory_space<vmem>>, vector<1x8x8xf32>
    %63 = vector.shape_cast %62 : vector<1x8x8xf32> to vector<8x8xf32>
    %64 = vector.shape_cast %61 : vector<8x8xf32> to vector<1x8x8xf32>
    tpu.vector_store %arg19[%c1, %c0_43, %c0_44], %64 {strides = array<i32>} : memref<8x8x8xf32, #tpu.memory_space<vmem>>, vector<1x8x8xf32>,
    %cst_45 = arith.constant dense<0.000000e+00> : vector<8x56xf32>
    %65 = tpu.matmul %61, %24, %cst_45 {dimension_numbers = #tpu.dot_dimension_numbers<[1], [0], [0], [1], [0, 0, 1, 1], [], []>} : vector<8x8xf32>, vector<8x56xf32>, vector<8x56xf32> -> vector<8x56xf32>
    %66 = vector.extract_strided_slice %65 {offsets = [0, 0], sizes = [8, 8], strides = [1, 1]} : vector<8x56xf32> to vector<8x8xf32>
    %67 = vector.extract_strided_slice %65 {offsets = [0, 8], sizes = [8, 16], strides = [1, 1]} : vector<8x56xf32> to vector<8x16xf32>
    %68 = arith.addf %67, %29 : vector<8x16xf32>
    %69 = vector.extract_strided_slice %65 {offsets = [0, 24], sizes = [8, 32], strides = [1, 1]} : vector<8x56xf32> to vector<8x32xf32>
    %70 = arith.addf %69, %32 : vector<8x32xf32>
    %71 = math.tanh %70 : vector<8x32xf32>
    %cst_46 = arith.constant dense<0.000000e+00> : vector<8x32xf32>
    %72 = tpu.matmul %71, %25, %cst_46 {dimension_numbers = #tpu.dot_dimension_numbers<[1], [0], [0], [1], [0, 0, 1, 1], [], []>} : vector<8x32xf32>, vector<32x32xf32>, vector<8x32xf32> -> vector<8x32xf32>
    %73 = arith.addf %72, %35 : vector<8x32xf32>
    %74 = math.tanh %73 : vector<8x32xf32>
    %cst_47 = arith.constant dense<0.000000e+00> : vector<8x16xf32>
    %75 = tpu.matmul %74, %26, %cst_47 {dimension_numbers = #tpu.dot_dimension_numbers<[1], [0], [0], [1], [0, 0, 1, 1], [], []>} : vector<8x32xf32>, vector<32x16xf32>, vector<8x16xf32> -> vector<8x16xf32>
    %76 = arith.addf %68, %75 : vector<8x16xf32>
    %77 = arith.addf %76, %38 : vector<8x16xf32>
    %c1_48 = arith.constant 1 : index
    %c0_49 = arith.constant 0 : index
    %c0_50 = arith.constant 0 : index
    %78 = vector.load %arg1[%c1_48, %c0_49, %c0_50] : memref<8x8x16xf32, #tpu.memory_space<vmem>>, vector<1x8x16xf32>
    %79 = vector.shape_cast %78 : vector<1x8x16xf32> to vector<8x16xf32>
    %80 = arith.mulf %77, %79 : vector<8x16xf32>
    %81 = vector.extract_strided_slice %80 {offsets = [0, 0], sizes = [8, 8], strides = [1, 1]} : vector<8x16xf32> to vector<8x8xf32>
    %82 = vector.extract_strided_slice %80 {offsets = [0, 8], sizes = [8, 8], strides = [1, 1]} : vector<8x16xf32> to vector<8x8xf32>
    %83 = arith.addf %81, %82 : vector<8x8xf32>
    %84 = arith.addf %66, %83 : vector<8x8xf32>
    %c2 = arith.constant 2 : index
    %c0_51 = arith.constant 0 : index
    %c0_52 = arith.constant 0 : index
    %85 = vector.load %arg19[%c2, %c0_51, %c0_52] : memref<8x8x8xf32, #tpu.memory_space<vmem>>, vector<1x8x8xf32>
    %86 = vector.shape_cast %85 : vector<1x8x8xf32> to vector<8x8xf32>
    %87 = vector.shape_cast %84 : vector<8x8xf32> to vector<1x8x8xf32>
    tpu.vector_store %arg19[%c2, %c0_51, %c0_52], %87 {strides = array<i32>} : memref<8x8x8xf32, #tpu.memory_space<vmem>>, vector<1x8x8xf32>,
    %cst_53 = arith.constant dense<0.000000e+00> : vector<8x56xf32>
    %88 = tpu.matmul %84, %24, %cst_53 {dimension_numbers = #tpu.dot_dimension_numbers<[1], [0], [0], [1], [0, 0, 1, 1], [], []>} : vector<8x8xf32>, vector<8x56xf32>, vector<8x56xf32> -> vector<8x56xf32>
    %89 = vector.extract_strided_slice %88 {offsets = [0, 0], sizes = [8, 8], strides = [1, 1]} : vector<8x56xf32> to vector<8x8xf32>
    %90 = vector.extract_strided_slice %88 {offsets = [0, 8], sizes = [8, 16], strides = [1, 1]} : vector<8x56xf32> to vector<8x16xf32>
    %91 = arith.addf %90, %29 : vector<8x16xf32>
    %92 = vector.extract_strided_slice %88 {offsets = [0, 24], sizes = [8, 32], strides = [1, 1]} : vector<8x56xf32> to vector<8x32xf32>
    %93 = arith.addf %92, %32 : vector<8x32xf32>
    %94 = math.tanh %93 : vector<8x32xf32>
    %cst_54 = arith.constant dense<0.000000e+00> : vector<8x32xf32>
    %95 = tpu.matmul %94, %25, %cst_54 {dimension_numbers = #tpu.dot_dimension_numbers<[1], [0], [0], [1], [0, 0, 1, 1], [], []>} : vector<8x32xf32>, vector<32x32xf32>, vector<8x32xf32> -> vector<8x32xf32>
    %96 = arith.addf %95, %35 : vector<8x32xf32>
    %97 = math.tanh %96 : vector<8x32xf32>
    %cst_55 = arith.constant dense<0.000000e+00> : vector<8x16xf32>
    %98 = tpu.matmul %97, %26, %cst_55 {dimension_numbers = #tpu.dot_dimension_numbers<[1], [0], [0], [1], [0, 0, 1, 1], [], []>} : vector<8x32xf32>, vector<32x16xf32>, vector<8x16xf32> -> vector<8x16xf32>
    %99 = arith.addf %91, %98 : vector<8x16xf32>
    %100 = arith.addf %99, %38 : vector<8x16xf32>
    %c2_56 = arith.constant 2 : index
    %c0_57 = arith.constant 0 : index
    %c0_58 = arith.constant 0 : index
    %101 = vector.load %arg1[%c2_56, %c0_57, %c0_58] : memref<8x8x16xf32, #tpu.memory_space<vmem>>, vector<1x8x16xf32>
    %102 = vector.shape_cast %101 : vector<1x8x16xf32> to vector<8x16xf32>
    %103 = arith.mulf %100, %102 : vector<8x16xf32>
    %104 = vector.extract_strided_slice %103 {offsets = [0, 0], sizes = [8, 8], strides = [1, 1]} : vector<8x16xf32> to vector<8x8xf32>
    %105 = vector.extract_strided_slice %103 {offsets = [0, 8], sizes = [8, 8], strides = [1, 1]} : vector<8x16xf32> to vector<8x8xf32>
    %106 = arith.addf %104, %105 : vector<8x8xf32>
    %107 = arith.addf %89, %106 : vector<8x8xf32>
    %c3 = arith.constant 3 : index
    %c0_59 = arith.constant 0 : index
    %c0_60 = arith.constant 0 : index
    %108 = vector.load %arg19[%c3, %c0_59, %c0_60] : memref<8x8x8xf32, #tpu.memory_space<vmem>>, vector<1x8x8xf32>
    %109 = vector.shape_cast %108 : vector<1x8x8xf32> to vector<8x8xf32>
    %110 = vector.shape_cast %107 : vector<8x8xf32> to vector<1x8x8xf32>
    tpu.vector_store %arg19[%c3, %c0_59, %c0_60], %110 {strides = array<i32>} : memref<8x8x8xf32, #tpu.memory_space<vmem>>, vector<1x8x8xf32>,
    %cst_61 = arith.constant dense<0.000000e+00> : vector<8x56xf32>
    %111 = tpu.matmul %107, %24, %cst_61 {dimension_numbers = #tpu.dot_dimension_numbers<[1], [0], [0], [1], [0, 0, 1, 1], [], []>} : vector<8x8xf32>, vector<8x56xf32>, vector<8x56xf32> -> vector<8x56xf32>
    %112 = vector.extract_strided_slice %111 {offsets = [0, 0], sizes = [8, 8], strides = [1, 1]} : vector<8x56xf32> to vector<8x8xf32>
    %113 = vector.extract_strided_slice %111 {offsets = [0, 8], sizes = [8, 16], strides = [1, 1]} : vector<8x56xf32> to vector<8x16xf32>
    %114 = arith.addf %113, %29 : vector<8x16xf32>
    %115 = vector.extract_strided_slice %111 {offsets = [0, 24], sizes = [8, 32], strides = [1, 1]} : vector<8x56xf32> to vector<8x32xf32>
    %116 = arith.addf %115, %32 : vector<8x32xf32>
    %117 = math.tanh %116 : vector<8x32xf32>
    %cst_62 = arith.constant dense<0.000000e+00> : vector<8x32xf32>
    %118 = tpu.matmul %117, %25, %cst_62 {dimension_numbers = #tpu.dot_dimension_numbers<[1], [0], [0], [1], [0, 0, 1, 1], [], []>} : vector<8x32xf32>, vector<32x32xf32>, vector<8x32xf32> -> vector<8x32xf32>
    %119 = arith.addf %118, %35 : vector<8x32xf32>
    %120 = math.tanh %119 : vector<8x32xf32>
    %cst_63 = arith.constant dense<0.000000e+00> : vector<8x16xf32>
    %121 = tpu.matmul %120, %26, %cst_63 {dimension_numbers = #tpu.dot_dimension_numbers<[1], [0], [0], [1], [0, 0, 1, 1], [], []>} : vector<8x32xf32>, vector<32x16xf32>, vector<8x16xf32> -> vector<8x16xf32>
    %122 = arith.addf %114, %121 : vector<8x16xf32>
    %123 = arith.addf %122, %38 : vector<8x16xf32>
    %c3_64 = arith.constant 3 : index
    %c0_65 = arith.constant 0 : index
    %c0_66 = arith.constant 0 : index
    %124 = vector.load %arg1[%c3_64, %c0_65, %c0_66] : memref<8x8x16xf32, #tpu.memory_space<vmem>>, vector<1x8x16xf32>
    %125 = vector.shape_cast %124 : vector<1x8x16xf32> to vector<8x16xf32>
    %126 = arith.mulf %123, %125 : vector<8x16xf32>
    %127 = vector.extract_strided_slice %126 {offsets = [0, 0], sizes = [8, 8], strides = [1, 1]} : vector<8x16xf32> to vector<8x8xf32>
    %128 = vector.extract_strided_slice %126 {offsets = [0, 8], sizes = [8, 8], strides = [1, 1]} : vector<8x16xf32> to vector<8x8xf32>
    %129 = arith.addf %127, %128 : vector<8x8xf32>
    %130 = arith.addf %112, %129 : vector<8x8xf32>
    %c4 = arith.constant 4 : index
    %c0_67 = arith.constant 0 : index
    %c0_68 = arith.constant 0 : index
    %131 = vector.load %arg19[%c4, %c0_67, %c0_68] : memref<8x8x8xf32, #tpu.memory_space<vmem>>, vector<1x8x8xf32>
    %132 = vector.shape_cast %131 : vector<1x8x8xf32> to vector<8x8xf32>
    %133 = vector.shape_cast %130 : vector<8x8xf32> to vector<1x8x8xf32>
    tpu.vector_store %arg19[%c4, %c0_67, %c0_68], %133 {strides = array<i32>} : memref<8x8x8xf32, #tpu.memory_space<vmem>>, vector<1x8x8xf32>,
    %cst_69 = arith.constant dense<0.000000e+00> : vector<8x56xf32>
    %134 = tpu.matmul %130, %24, %cst_69 {dimension_numbers = #tpu.dot_dimension_numbers<[1], [0], [0], [1], [0, 0, 1, 1], [], []>} : vector<8x8xf32>, vector<8x56xf32>, vector<8x56xf32> -> vector<8x56xf32>
    %135 = vector.extract_strided_slice %134 {offsets = [0, 0], sizes = [8, 8], strides = [1, 1]} : vector<8x56xf32> to vector<8x8xf32>
    %136 = vector.extract_strided_slice %134 {offsets = [0, 8], sizes = [8, 16], strides = [1, 1]} : vector<8x56xf32> to vector<8x16xf32>
    %137 = arith.addf %136, %29 : vector<8x16xf32>
    %138 = vector.extract_strided_slice %134 {offsets = [0, 24], sizes = [8, 32], strides = [1, 1]} : vector<8x56xf32> to vector<8x32xf32>
    %139 = arith.addf %138, %32 : vector<8x32xf32>
    %140 = math.tanh %139 : vector<8x32xf32>
    %cst_70 = arith.constant dense<0.000000e+00> : vector<8x32xf32>
    %141 = tpu.matmul %140, %25, %cst_70 {dimension_numbers = #tpu.dot_dimension_numbers<[1], [0], [0], [1], [0, 0, 1, 1], [], []>} : vector<8x32xf32>, vector<32x32xf32>, vector<8x32xf32> -> vector<8x32xf32>
    %142 = arith.addf %141, %35 : vector<8x32xf32>
    %143 = math.tanh %142 : vector<8x32xf32>
    %cst_71 = arith.constant dense<0.000000e+00> : vector<8x16xf32>
    %144 = tpu.matmul %143, %26, %cst_71 {dimension_numbers = #tpu.dot_dimension_numbers<[1], [0], [0], [1], [0, 0, 1, 1], [], []>} : vector<8x32xf32>, vector<32x16xf32>, vector<8x16xf32> -> vector<8x16xf32>
    %145 = arith.addf %137, %144 : vector<8x16xf32>
    %146 = arith.addf %145, %38 : vector<8x16xf32>
    %c4_72 = arith.constant 4 : index
    %c0_73 = arith.constant 0 : index
    %c0_74 = arith.constant 0 : index
    %147 = vector.load %arg1[%c4_72, %c0_73, %c0_74] : memref<8x8x16xf32, #tpu.memory_space<vmem>>, vector<1x8x16xf32>
    %148 = vector.shape_cast %147 : vector<1x8x16xf32> to vector<8x16xf32>
    %149 = arith.mulf %146, %148 : vector<8x16xf32>
    %150 = vector.extract_strided_slice %149 {offsets = [0, 0], sizes = [8, 8], strides = [1, 1]} : vector<8x16xf32> to vector<8x8xf32>
    %151 = vector.extract_strided_slice %149 {offsets = [0, 8], sizes = [8, 8], strides = [1, 1]} : vector<8x16xf32> to vector<8x8xf32>
    %152 = arith.addf %150, %151 : vector<8x8xf32>
    %153 = arith.addf %135, %152 : vector<8x8xf32>
    %c5 = arith.constant 5 : index
    %c0_75 = arith.constant 0 : index
    %c0_76 = arith.constant 0 : index
    %154 = vector.load %arg19[%c5, %c0_75, %c0_76] : memref<8x8x8xf32, #tpu.memory_space<vmem>>, vector<1x8x8xf32>
    %155 = vector.shape_cast %154 : vector<1x8x8xf32> to vector<8x8xf32>
    %156 = vector.shape_cast %153 : vector<8x8xf32> to vector<1x8x8xf32>
    tpu.vector_store %arg19[%c5, %c0_75, %c0_76], %156 {strides = array<i32>} : memref<8x8x8xf32, #tpu.memory_space<vmem>>, vector<1x8x8xf32>,
    %cst_77 = arith.constant dense<0.000000e+00> : vector<8x56xf32>
    %157 = tpu.matmul %153, %24, %cst_77 {dimension_numbers = #tpu.dot_dimension_numbers<[1], [0], [0], [1], [0, 0, 1, 1], [], []>} : vector<8x8xf32>, vector<8x56xf32>, vector<8x56xf32> -> vector<8x56xf32>
    %158 = vector.extract_strided_slice %157 {offsets = [0, 0], sizes = [8, 8], strides = [1, 1]} : vector<8x56xf32> to vector<8x8xf32>
    %159 = vector.extract_strided_slice %157 {offsets = [0, 8], sizes = [8, 16], strides = [1, 1]} : vector<8x56xf32> to vector<8x16xf32>
    %160 = arith.addf %159, %29 : vector<8x16xf32>
    %161 = vector.extract_strided_slice %157 {offsets = [0, 24], sizes = [8, 32], strides = [1, 1]} : vector<8x56xf32> to vector<8x32xf32>
    %162 = arith.addf %161, %32 : vector<8x32xf32>
    %163 = math.tanh %162 : vector<8x32xf32>
    %cst_78 = arith.constant dense<0.000000e+00> : vector<8x32xf32>
    %164 = tpu.matmul %163, %25, %cst_78 {dimension_numbers = #tpu.dot_dimension_numbers<[1], [0], [0], [1], [0, 0, 1, 1], [], []>} : vector<8x32xf32>, vector<32x32xf32>, vector<8x32xf32> -> vector<8x32xf32>
    %165 = arith.addf %164, %35 : vector<8x32xf32>
    %166 = math.tanh %165 : vector<8x32xf32>
    %cst_79 = arith.constant dense<0.000000e+00> : vector<8x16xf32>
    %167 = tpu.matmul %166, %26, %cst_79 {dimension_numbers = #tpu.dot_dimension_numbers<[1], [0], [0], [1], [0, 0, 1, 1], [], []>} : vector<8x32xf32>, vector<32x16xf32>, vector<8x16xf32> -> vector<8x16xf32>
    %168 = arith.addf %160, %167 : vector<8x16xf32>
    %169 = arith.addf %168, %38 : vector<8x16xf32>
    %c5_80 = arith.constant 5 : index
    %c0_81 = arith.constant 0 : index
    %c0_82 = arith.constant 0 : index
    %170 = vector.load %arg1[%c5_80, %c0_81, %c0_82] : memref<8x8x16xf32, #tpu.memory_space<vmem>>, vector<1x8x16xf32>
    %171 = vector.shape_cast %170 : vector<1x8x16xf32> to vector<8x16xf32>
    %172 = arith.mulf %169, %171 : vector<8x16xf32>
    %173 = vector.extract_strided_slice %172 {offsets = [0, 0], sizes = [8, 8], strides = [1, 1]} : vector<8x16xf32> to vector<8x8xf32>
    %174 = vector.extract_strided_slice %172 {offsets = [0, 8], sizes = [8, 8], strides = [1, 1]} : vector<8x16xf32> to vector<8x8xf32>
    %175 = arith.addf %173, %174 : vector<8x8xf32>
    %176 = arith.addf %158, %175 : vector<8x8xf32>
    %c6 = arith.constant 6 : index
    %c0_83 = arith.constant 0 : index
    %c0_84 = arith.constant 0 : index
    %177 = vector.load %arg19[%c6, %c0_83, %c0_84] : memref<8x8x8xf32, #tpu.memory_space<vmem>>, vector<1x8x8xf32>
    %178 = vector.shape_cast %177 : vector<1x8x8xf32> to vector<8x8xf32>
    %179 = vector.shape_cast %176 : vector<8x8xf32> to vector<1x8x8xf32>
    tpu.vector_store %arg19[%c6, %c0_83, %c0_84], %179 {strides = array<i32>} : memref<8x8x8xf32, #tpu.memory_space<vmem>>, vector<1x8x8xf32>,
    %cst_85 = arith.constant dense<0.000000e+00> : vector<8x56xf32>
    %180 = tpu.matmul %176, %24, %cst_85 {dimension_numbers = #tpu.dot_dimension_numbers<[1], [0], [0], [1], [0, 0, 1, 1], [], []>} : vector<8x8xf32>, vector<8x56xf32>, vector<8x56xf32> -> vector<8x56xf32>
    %181 = vector.extract_strided_slice %180 {offsets = [0, 0], sizes = [8, 8], strides = [1, 1]} : vector<8x56xf32> to vector<8x8xf32>
    %182 = vector.extract_strided_slice %180 {offsets = [0, 8], sizes = [8, 16], strides = [1, 1]} : vector<8x56xf32> to vector<8x16xf32>
    %183 = arith.addf %182, %29 : vector<8x16xf32>
    %184 = vector.extract_strided_slice %180 {offsets = [0, 24], sizes = [8, 32], strides = [1, 1]} : vector<8x56xf32> to vector<8x32xf32>
    %185 = arith.addf %184, %32 : vector<8x32xf32>
    %186 = math.tanh %185 : vector<8x32xf32>
    %cst_86 = arith.constant dense<0.000000e+00> : vector<8x32xf32>
    %187 = tpu.matmul %186, %25, %cst_86 {dimension_numbers = #tpu.dot_dimension_numbers<[1], [0], [0], [1], [0, 0, 1, 1], [], []>} : vector<8x32xf32>, vector<32x32xf32>, vector<8x32xf32> -> vector<8x32xf32>
    %188 = arith.addf %187, %35 : vector<8x32xf32>
    %189 = math.tanh %188 : vector<8x32xf32>
    %cst_87 = arith.constant dense<0.000000e+00> : vector<8x16xf32>
    %190 = tpu.matmul %189, %26, %cst_87 {dimension_numbers = #tpu.dot_dimension_numbers<[1], [0], [0], [1], [0, 0, 1, 1], [], []>} : vector<8x32xf32>, vector<32x16xf32>, vector<8x16xf32> -> vector<8x16xf32>
    %191 = arith.addf %183, %190 : vector<8x16xf32>
    %192 = arith.addf %191, %38 : vector<8x16xf32>
    %c6_88 = arith.constant 6 : index
    %c0_89 = arith.constant 0 : index
    %c0_90 = arith.constant 0 : index
    %193 = vector.load %arg1[%c6_88, %c0_89, %c0_90] : memref<8x8x16xf32, #tpu.memory_space<vmem>>, vector<1x8x16xf32>
    %194 = vector.shape_cast %193 : vector<1x8x16xf32> to vector<8x16xf32>
    %195 = arith.mulf %192, %194 : vector<8x16xf32>
    %196 = vector.extract_strided_slice %195 {offsets = [0, 0], sizes = [8, 8], strides = [1, 1]} : vector<8x16xf32> to vector<8x8xf32>
    %197 = vector.extract_strided_slice %195 {offsets = [0, 8], sizes = [8, 8], strides = [1, 1]} : vector<8x16xf32> to vector<8x8xf32>
    %198 = arith.addf %196, %197 : vector<8x8xf32>
    %199 = arith.addf %181, %198 : vector<8x8xf32>
    %c7 = arith.constant 7 : index
    %c0_91 = arith.constant 0 : index
    %c0_92 = arith.constant 0 : index
    %200 = vector.load %arg19[%c7, %c0_91, %c0_92] : memref<8x8x8xf32, #tpu.memory_space<vmem>>, vector<1x8x8xf32>
    %201 = vector.shape_cast %200 : vector<1x8x8xf32> to vector<8x8xf32>
    %202 = vector.shape_cast %199 : vector<8x8xf32> to vector<1x8x8xf32>
    tpu.vector_store %arg19[%c7, %c0_91, %c0_92], %202 {strides = array<i32>} : memref<8x8x8xf32, #tpu.memory_space<vmem>>, vector<1x8x8xf32>,
    %c0_93 = arith.constant 0 : index
    %c0_94 = arith.constant 0 : index
    %c0_95 = arith.constant 0 : index
    %203 = vector.load %arg19[%c0_93, %c0_94, %c0_95] : memref<8x8x8xf32, #tpu.memory_space<vmem>>, vector<8x8x8xf32>
    %204 = vector.shape_cast %203 : vector<8x8x8xf32> to vector<64x8xf32>
    %c0_96 = arith.constant 0 : index
    %c0_97 = arith.constant 0 : index
    %205 = vector.load %arg17[%c0_96, %c0_97] : memref<8x2xf32, #tpu.memory_space<vmem>>, vector<8x2xf32>
    %cst_98 = arith.constant dense<0.000000e+00> : vector<64x2xf32>
    %206 = tpu.matmul %204, %205, %cst_98 {dimension_numbers = #tpu.dot_dimension_numbers<[1], [0], [0], [1], [0, 0, 1, 1], [], []>} : vector<64x8xf32>, vector<8x2xf32>, vector<64x2xf32> -> vector<64x2xf32>
    %c0_99 = arith.constant 0 : index
    %c0_100 = arith.constant 0 : index
    %207 = vector.load %arg18[%c0_99, %c0_100] : memref<64x2xf32, #tpu.memory_space<vmem>>, vector<64x2xf32>
    tpu.vector_store %arg18[%c0_99, %c0_100], %206 {strides = array<i32>} : memref<64x2xf32, #tpu.memory_space<vmem>>, vector<64x2xf32>,
    return
  }
}

</mosaic_0001>

<bundles_post_ra>
// kernel: tpu_custom_call.1
= control target key start
LH: loop header
LB: loop body
LE: loop exit
PB: predicated region body
PF: predicated region fallthrough
CT: control target
= control target key end

     0   :  { %s3657_s0 = inlined_call_operand.hbm [shape: f32[8,16], index: 0, kind: input, shape index: {}]   ;;  %s3658_s1 = inlined_call_operand.vmem [shape: f32[8,8,16], index: 1, kind: input, shape index: {}]   ;;  %s3659_s2 = inlined_call_operand.vmem [shape: f32[16,8], index: 2, kind: input, shape index: {}]   ;;  %s3660_s3 = inlined_call_operand.vmem [shape: f32[1,8], index: 3, kind: input, shape index: {}]   ;;  %s3661_s4 = inlined_call_operand.hbm [shape: f32[16,32], index: 4, kind: input, shape index: {}]   ;;  %s3662_s5 = inlined_call_operand.hbm [shape: f32[1,32], index: 5, kind: input, shape index: {}]   ;;  %s3663_s6 = inlined_call_operand.vmem [shape: f32[32,32], index: 6, kind: input, shape index: {}]   ;;  %s3664_s7 = inlined_call_operand.hbm [shape: f32[1,32], index: 7, kind: input, shape index: {}]   ;;  %s3665_s8 = inlined_call_operand.vmem [shape: f32[32,8], index: 8, kind: input, shape index: {}]   ;;  %s3666_s9 = inlined_call_operand.hbm [shape: f32[1,8], index: 9, kind: input, shape index: {}]   ;;  %s3667_s10 = inlined_call_operand.hbm [shape: f32[8,56], index: 10, kind: input, shape index: {}]   ;;  %s3668_s11 = inlined_call_operand.hbm [shape: f32[1,16], index: 11, kind: input, shape index: {}]   ;;  %s3669_s12 = inlined_call_operand.hbm [shape: f32[1,32], index: 12, kind: input, shape index: {}]   ;;  %s3670_s13 = inlined_call_operand.vmem [shape: f32[32,32], index: 13, kind: input, shape index: {}]   ;;  %s3671_s14 = inlined_call_operand.hbm [shape: f32[1,32], index: 14, kind: input, shape index: {}]   ;;  %s3672_s15 = inlined_call_operand.vmem [shape: f32[32,16], index: 15, kind: input, shape index: {}]   ;;  %s3673_s16 = inlined_call_operand.vmem [shape: f32[1,16], index: 16, kind: input, shape index: {}]   ;;  %s3674_s17 = inlined_call_operand.vmem [shape: f32[8,2], index: 17, kind: input, shape index: {}]   ;;  %s3675_s18 = inlined_call_operand.vmem [shape: f32[64,2], index: 18, kind: output, shape index: {}]  }
   0x1   :  { %3678 = sst [smem:[#allocation22_spill]] %s3657_s0 }
   0x2   :  { %3679 = sst [smem:[#allocation23_spill]] %s3658_s1 }
   0x3   :  { %3680 = sst [smem:[#allocation24_spill]] %s3659_s2 }
   0x4   :  { %23 = vsyncpa [#allocation4], 0 }
   0x5   :  { %24 = vsyncpa [#allocation6], 0 }
   0x6   :  { %25 = vsyncpa [#allocation9], 0 }
   0x7   :  { %26 = vsyncpa [#allocation12], 0 }
   0x8   :  { %27 = vsyncpa [#allocation15], 0  ;;  %s3084_s27 = smov [#allocation5]  }
   0x9   :  { %s49_s28 = sshll.u32 %s3084_s27, 4  ;;  %s50_s28 = int_to_ptr.vmem [resolvable:$true] %s49_s28 }
   0xa   :  { %s2902_s29 = scalar_lea.vmem %s50_s28, 256  ;;  %p2907_p1 = scmp.lt.s32.totalorder %s50_s28, %s50_s28 }
   0xb   :  { %p2903_p0 = scmp.ne.s32.totalorder %s50_s28, %s2902_s29  ;;  %p2908_p2 = scmp.lt.s32.totalorder %s2902_s29, %s2902_s29 }
   0xd   :  { %p2909_p3 = por %p2908_p2, %p2907_p1 }
   0xf   :  { %p2910_p4 = pnand %p2909_p3, %p2903_p0 }
  0x11   :  { %2913 = shalt.err (!%p2910_p4)
}
  0x12   :  { %s3085_s30 = smov 128   ;;  %s3086_s0 = smov 8  }
  0x13   :  { %55 = dma.hbm_to_vmem [thread:$0]  %s3661_s4, 256, %s50_s28, [#allocation6], %s3085_s30, %s3085_s30, %s3086_s0  }
  0x14   :  { %s3087_s20 = smov [#allocation8]   ;;  %s3088_s22 = smov [#allocation11]  }
  0x15   :  { %s74_s21 = sshll.u32 %s3087_s20, 4  ;;  %s96_s2 = sshll.u32 %s3088_s22, 4  ;;  %s75_s21 = int_to_ptr.vmem [resolvable:$true] %s74_s21  ;;  %s97_s2 = int_to_ptr.vmem [resolvable:$true] %s96_s2 }
  0x16   :  { %s2922_s23 = scalar_lea.vmem %s75_s21, 16  ;;  %s2926_s24 = scalar_lea.vmem %s75_s21, 32 }
  0x17   :  { %p2923_p5 = scmp.ne.s32.totalorder %s75_s21, %s2922_s23  ;;  %p2927_p6 = scmp.lt.s32.totalorder %s75_s21, %s75_s21 }
  0x18   :  { %p2928_p7 = scmp.lt.s32.totalorder %s2926_s24, %s2922_s23 }
  0x1a   :  { %p2929_p8 = por %p2928_p7, %p2927_p6 }
  0x1c   :  { %p2930_p9 = pnand %p2929_p8, %p2923_p5 }
  0x1e   :  { %2933 = shalt.err (!%p2930_p9)
}
  0x1f   :  { %77 = dma.hbm_to_vmem [thread:$0]  %s3664_s7, 16, %s75_s21, [#allocation9]  }
  0x20   :  { %s2942_s27 = scalar_lea.vmem %s97_s2, 128  ;;  %p2947_p11 = scmp.lt.s32.totalorder %s97_s2, %s97_s2 }
  0x21   :  { %p2943_p10 = scmp.ne.s32.totalorder %s97_s2, %s2942_s27  ;;  %p2948_p12 = scmp.lt.s32.totalorder %s2942_s27, %s2942_s27 }
  0x23   :  { %p2949_p13 = por %p2948_p12, %p2947_p11 }
  0x25   :  { %p2950_p0 = pnand %p2949_p13, %p2943_p10 }
  0x27   :  { %2953 = shalt.err (!%p2950_p0)
}
  0x28   :  { %99 = dma.hbm_to_vmem [thread:$0]  %s3667_s10, 128, %s97_s2, [#allocation12]  }
  0x29   :  { %s3089_s29 = smov [#allocation14]   ;;  %s3090_s19 = smov [#allocation3]  }
  0x2a   :  { %s116_s30 = sshll.u32 %s3089_s29, 4  ;;  %s34_s1 = sshll.u32 %s3090_s19, 4  ;;  %s117_s30 = int_to_ptr.vmem [resolvable:$true] %s116_s30  ;;  %s35_s1 = int_to_ptr.vmem [resolvable:$true] %s34_s1 }
  0x2b   :  { %s2962_s20 = scalar_lea.vmem %s117_s30, 16  ;;  %s2966_s7 = scalar_lea.vmem %s117_s30, 32 }
  0x2c   :  { %p2963_p1 = scmp.ne.s32.totalorder %s117_s30, %s2962_s20  ;;  %p2967_p2 = scmp.lt.s32.totalorder %s117_s30, %s117_s30 }
  0x2d   :  { %p2968_p3 = scmp.lt.s32.totalorder %s2966_s7, %s2962_s20 }
  0x2f   :  { %p2969_p4 = por %p2968_p3, %p2967_p2 }
  0x31   :  { %p2970_p5 = pnand %p2969_p4, %p2963_p1 }
  0x33   :  { %2973 = shalt.err (!%p2970_p5)
}
  0x34   :  { %119 = dma.hbm_to_vmem [thread:$0]  %s3669_s12, 16, %s117_s30, [#allocation15]  }
  0x35   :  { %s2982_s23 = scalar_lea.vmem %s35_s1, 128  ;;  %p2987_p7 = scmp.lt.s32.totalorder %s35_s1, %s35_s1 }
  0x36   :  { %p2983_p6 = scmp.ne.s32.totalorder %s35_s1, %s2982_s23  ;;  %p2988_p8 = scmp.lt.s32.totalorder %s2982_s23, %s2982_s23 }
  0x38   :  { %p2989_p9 = por %p2988_p8, %p2987_p7 }
  0x3a   :  { %p2990_p10 = pnand %p2989_p9, %p2983_p6 }
  0x3c   :  { %2993 = shalt.err (!%p2990_p10)
}
  0x3d   :  { %s3681_s24 = sld [smem:[#allocation22_spill]]  ;;  %s3091_s25 = smov [#allocation7]  }
  0x3e   :  { %s62_s26 = sshll.u32 %s3091_s25, 4  ;;  %s3092_s27 = smov [#allocation10]   ;;  %s63_s26 = int_to_ptr.vmem [resolvable:$true] %s62_s26 }
  0x3f   :  { %s86_s4 = sshll.u32 %s3092_s27, 4  ;;  %s3002_s28 = scalar_lea.vmem %s63_s26, 16  ;;  %s87_s4 = int_to_ptr.vmem [resolvable:$true] %s86_s4 }
  0x40   :  { %p3003_p11 = scmp.ne.s32.totalorder %s63_s26, %s3002_s28  ;;  %s3006_s12 = scalar_lea.vmem %s63_s26, 32 }
  0x41   :  { %p3007_p12 = scmp.lt.s32.totalorder %s63_s26, %s63_s26  ;;  %p3008_p13 = scmp.lt.s32.totalorder %s3006_s12, %s3002_s28 }
  0x43   :  { %37 = dma.hbm_to_vmem [thread:$0]  %s3681_s24, 128, %s35_s1, [#allocation4]  }
  0x44   :  { %p3009_p0 = por %p3008_p13, %p3007_p12 }
  0x46   :  { %p3010_p1 = pnand %p3009_p0, %p3003_p11 }
  0x48   :  { %3013 = shalt.err (!%p3010_p1)
}
  0x49   :  { %65 = dma.hbm_to_vmem [thread:$0]  %s3662_s5, 16, %s63_s26, [#allocation6]  }
  0x4a   :  { %s3022_s19 = scalar_lea.vmem %s87_s4, 16  ;;  %s3026_s1 = scalar_lea.vmem %s87_s4, 32 }
  0x4b   :  { %p3023_p2 = scmp.ne.s32.totalorder %s87_s4, %s3022_s19  ;;  %p3027_p3 = scmp.lt.s32.totalorder %s87_s4, %s87_s4 }
  0x4c   :  { %p3028_p4 = scmp.lt.s32.totalorder %s3026_s1, %s3022_s19 }
  0x4e   :  { %p3029_p5 = por %p3028_p4, %p3027_p3 }
  0x50   :  { %p3030_p6 = pnand %p3029_p5, %p3023_p2 }
  0x52   :  { %3033 = shalt.err (!%p3030_p6)
}
  0x53   :  { %89 = dma.hbm_to_vmem [thread:$0]  %s3666_s9, 16, %s87_s4, [#allocation9]  }
  0x54   :  { %s3093_s21 = smov [#allocation13]   ;;  %s3094_s23 = smov [#allocation16]  }
  0x55   :  { %s106_s22 = sshll.u32 %s3093_s21, 4  ;;  %s128_s10 = sshll.u32 %s3094_s23, 4  ;;  %s107_s22 = int_to_ptr.vmem [resolvable:$true] %s106_s22  ;;  %s129_s10 = int_to_ptr.vmem [resolvable:$true] %s128_s10 }
  0x56   :  { %s3042_s2 = scalar_lea.vmem %s107_s22, 16  ;;  %s3046_s5 = scalar_lea.vmem %s107_s22, 32 }
  0x57   :  { %p3043_p7 = scmp.ne.s32.totalorder %s107_s22, %s3042_s2  ;;  %p3047_p8 = scmp.lt.s32.totalorder %s107_s22, %s107_s22 }
  0x58   :  { %p3048_p9 = scmp.lt.s32.totalorder %s3046_s5, %s3042_s2 }
  0x5a   :  { %p3049_p10 = por %p3048_p9, %p3047_p8 }
  0x5c   :  { %p3050_p11 = pnand %p3049_p10, %p3043_p7 }
  0x5e   :  { %3053 = shalt.err (!%p3050_p11)
}
  0x5f   :  { %109 = dma.hbm_to_vmem [thread:$0]  %s3668_s11, 16, %s107_s22, [#allocation12]  }
  0x60   :  { %s3062_s26 = scalar_lea.vmem %s129_s10, 16  ;;  %s3066_s9 = scalar_lea.vmem %s129_s10, 32 }
  0x61   :  { %p3063_p12 = scmp.ne.s32.totalorder %s129_s10, %s3062_s26  ;;  %p3067_p13 = scmp.lt.s32.totalorder %s129_s10, %s129_s10 }
  0x62   :  { %p3068_p0 = scmp.lt.s32.totalorder %s3066_s9, %s3062_s26 }
  0x64   :  { %p3069_p1 = por %p3068_p0, %p3067_p13 }
  0x66   :  { %p3070_p2 = pnand %p3069_p1, %p3063_p12 }
  0x68   :  { %3073 = shalt.err (!%p3070_p2)
}
  0x69   :  { %131 = dma.hbm_to_vmem [thread:$0]  %s3671_s14, 16, %s129_s10, [#allocation15]  }
  0x6a   :  { %3074 = dma.done.wait [#allocation4], 128  }
  0x6b   :  { %3075 = vsyncadd [#allocation4], 4294967168 }
  0x6c   :  { %3076 = dma.done.wait [#allocation6], 272  }
  0x6d   :  { %3077 = vsyncadd [#allocation6], 4294967024 }
  0x6e   :  { %3078 = dma.done.wait [#allocation9], 32  }
  0x6f   :  { %3079 = vsyncadd [#allocation9], 4294967264 }
  0x70   :  { %3080 = dma.done.wait [#allocation12], 144  }
  0x71   :  { %3081 = vsyncadd [#allocation12], 4294967152 }
  0x72   :  { %3082 = dma.done.wait [#allocation15], 32  }
  0x73   :  { %3083 = vsyncadd [#allocation15], 4294967264  ;;  %v3095_v0 = vmov 0.0   ;;  %vm3096_vm0 = vmmov 0   ;;  %s3682_s28 = sld [smem:[#allocation24_spill]]  ;;  %v165_v3 = vld [vmem:[#allocation3] sm:$0xff] }
  0x74   :  { %2607 = vmatprep.subr.mxu0 %v3095_v0  ;;  %2611 = vmatprep.mubr.msk.f32.mxu0 %vm3096_vm0, %v3095_v0  ;;  %vm175_vm1 = vcmask 130048   ;;  %v250_v4 = vld [vmem:[#allocation5 + $0x8] sm:$0xff]  ;;  %v249_v5 = vld [vmem:[#allocation5] sm:$0xff]  ;;  %v332_v6 = vld [vmem:[%s3663_s6 + $0x18] sm:$0xff]  ;;  %vm340_vm2 = vcmask 261120   ;;  %vm535_vm3 = vcmask 64512  }
  0x75   :  { %2632 = vmatprep.subr.mxu1 %v3095_v0  ;;  %2640 = vmatprep.mubr.msk.f32.mxu1 %vm3096_vm0, %v3095_v0  ;;  %v331_v7 = vld [vmem:[%s3663_s6 + $0x10] sm:$0xff]  ;;  %v330_v8 = vld [vmem:[%s3663_s6 + $0x8] sm:$0xff]  ;;  %v329_v9 = vld [vmem:[%s3663_s6] sm:$0xff]  ;;  %s3098_s1 = smov 104   ;;  %s3683_s25 = sld [smem:[#allocation23_spill]]  ;;  %vm2433_vm4 = vcmask 15360  }
  0x76   :  { %v2453_v12 = vld [vmem:[#allocation7] ss:$0 sm:$0xff]  ;;  %v417_v18 = vld [vmem:[%s3665_s8 + $0x10] sm:$0xff]  ;;  %v416_v19 = vld [vmem:[%s3665_s8 + $0x8] sm:$0xff] }
  0x77   :  { %v418_v17 = vld [vmem:[%s3665_s8 + $0x18] sm:$0xff]  ;;  %v415_v20 = vld [vmem:[%s3665_s8] sm:$0xff]  ;;  %v2460_v27 = vld [vmem:[#allocation14] ss:$0 sm:$0xff]  ;;  %s3097_s8 = smov 24  }
  0x78   :  { %2633 = vmatpush3.msra.mxu1 %v418_v17  ;;  %v2455_v21 = vld [vmem:[#allocation8] ss:$0 sm:$0xff]  ;;  %v3281_v26 = vld [vmem:[#allocation11] sm:$0xff]  ;;  %v2459_v28 = vld [vmem:[#allocation13] ss:$0 sm:$0xff]  ;;  %614 = vrot.lane.b32.xlu0 %v2460_v27, %s3097_s8 }
  0x79   :  { %v167_v1 = vld [vmem:[%s3682_s28 + $0x8] sm:$0xff]  ;;  %v166_v2 = vld [vmem:[%s3682_s28] sm:$0xff]  ;;  %2634 = vmatprep.subr.mxu1 %v3095_v0  ;;  %610 = vrot.lane.b32.xlu1 %v2459_v28, %s3086_s0  ;;  %v2458_v32 = vld [vmem:[#allocation10] ss:$0 sm:$0xff] }
  0x7a   :  { %2608 = vmatpush3.msra.mxu0 %v167_v1  ;;  %2635 = vmatpush3.msra.mxu1 %v417_v18  ;;  %v2451_v29 = vld [vmem:[%s3660_s3] ss:$0 sm:$0xff]  ;;  %v3296_v36 = vld [vmem:[%s3670_s13 + $0x18] sm:$0xff]  ;;  %v3301_v37 = vld [vmem:[%s3670_s13 + $0x10] sm:$0xff] }
  0x7b   :  { %2609 = vmatprep.subr.mxu0 %v3095_v0  ;;  %2636 = vmatprep.subr.mxu1 %v3095_v0  ;;  %v3308_v38 = vld [vmem:[%s3670_s13 + $0x8] sm:$0xff]  ;;  %v3315_v39 = vld [vmem:[%s3670_s13] sm:$0xff]  ;;  %v3333_v46 = vld [vmem:[%s3672_s15 + $0x18] sm:$0xff] }
  0x7c   :  { %2610 = vmatpush3.msra.mxu0 %v166_v2  ;;  %2637 = vmatpush3.msra.mxu1 %v416_v19  ;;  %v3338_v47 = vld [vmem:[%s3672_s15 + $0x10] sm:$0xff]  ;;  %v3345_v48 = vld [vmem:[%s3672_s15 + $0x8] sm:$0xff]  ;;  %v3352_v49 = vld [vmem:[%s3672_s15] sm:$0xff] }
  0x7d   :  { %2612 = vmatmul.mubr.msk.f32.vlgmr.msra.gmra.mxu0 %vm175_vm1, %v165_v3  ;;  %2614 = vmatprep.subr.mxu0 %v3095_v0  ;;  %v3358_v50 = vld [vmem:[#allocation16] ss:$0 sm:$0xff]  ;;  %v2462_v55 = vld [vmem:[%s3673_s16] ss:$0 sm:$0xff]  ;;  %s3099_s16 = smov 120  }
  0x7e   :  { %2615 = vmatpush3.msra.mxu0 %v250_v4  ;;  %2618 = vmatprep.mubr.msk.f32.mxu0 %vm3096_vm0, %v3095_v0  ;;  %v777_v58 = vld [vmem:[%s3683_s25] sm:$0xff]  ;;  %v2469_v17 = vld [vmem:[%s3683_s25 + $0x8] sm:$0xff] }
  0x7f   :  { %2616 = vmatprep.subr.mxu0 %v3095_v0  ;;  %2638 = vmatprep.subr.mxu1 %v3095_v0 }
  0x80   :  { %2617 = vmatpush3.msra.mxu0 %v249_v5  ;;  %2639 = vmatpush3.msra.mxu1 %v415_v20 }
  0x81   :  { %2619 = vmatmul.mubr.msk.f32.vlgmr.msra.gmra.mxu0 %vm175_vm1, %v165_v3  ;;  %2621 = vmatprep.subr.mxu0 %v3095_v0 }
  0x82   :  { %2629 = vmatprep.mubr.msk.f32.mxu0 %vm3096_vm0, %v3095_v0  ;;  %2622 = vmatpush3.msra.mxu0 %v332_v6 }
  0x83   :  { %2623 = vmatprep.subr.mxu0 %v3095_v0  ;;  %2648 = vmatprep.subr.mxu1 %v3095_v0 }
  0x84   :  { %2624 = vmatpush3.msra.mxu0 %v331_v7 }
  0x85   :  { %2625 = vmatprep.subr.mxu0 %v3095_v0 }
  0x86   :  { %2626 = vmatpush3.msra.mxu0 %v330_v8 }
  0x87   :  { %2627 = vmatprep.subr.mxu0 %v3095_v0 }
  0x88   :  { %2628 = vmatpush3.msra.mxu0 %v329_v9 }
  0x89   :  { %2643 = vmatprep.subr.mxu0 %v3095_v0 }
  0xea   :  { %v3321_v40 = vpop.permute.xlu0 %614 }
  0xeb   :  { %v3381_v59 = vpop.permute.xlu1 %610 }
 0x13d   :  { %v245_v10 = vpop.f32.mrf.mxu0 }
 0x13e   :  { %v246_v30 = vadd.f32 %v2451_v29, %v245_v10 }
 0x13f   :  { %v2613_v11 = vpop.f32.mrf.mxu0 }
 0x141   :  { %v324_v13 = vpop.f32.mrf.mxu0 }
 0x142   :  { %v325_v14 = vadd.f32 %v2453_v12, %v324_v13 }
 0x143   :  { %v2620_v15 = vpop.f32.mrf.mxu0 }
 0x144   :  { %2862 = vtanh.f32 %v325_v14 }
 0x151   :  { %v2863_v16 = vpop.eup %2862 }
 0x152   :  { %2630 = vmatmul.mubr.msk.f32.vlgmr.msra.gmra.mxu0 %vm340_vm2, %v2863_v16 }
 0x153   :  { %2645 = vmatprep.mubr.msk.f32.mxu0 %vm3096_vm0, %v3095_v0  ;;  %2644 = vmatpush3.msra.mxu0 %v3281_v26 }
 0x154   :  { %2659 = vmatprep.subr.mxu0 %v3095_v0 }
 0x212   :  { %v410_v22 = vpop.f32.mrf.mxu0 }
 0x213   :  { %v411_v23 = vadd.f32 %v2455_v21, %v410_v22 }
 0x214   :  { %v2631_v24 = vpop.f32.mrf.mxu0 }
 0x215   :  { %2864 = vtanh.f32 %v411_v23 }
 0x222   :  { %v2865_v25 = vpop.eup %2864 }
 0x223   :  { %2641 = vmatmul.mubr.msk.f32.vlgmr.msra.gmra.mxu1 %vm340_vm2, %v2865_v25 }
 0x224   :  { %2656 = vmatprep.mubr.msk.f32.mxu1 %vm3096_vm0, %v3095_v0  ;;  %2649 = vmatpush3.msra.mxu1 %v3296_v36 }
 0x225   :  { %2650 = vmatprep.subr.mxu1 %v3095_v0 }
 0x226   :  { %2651 = vmatpush3.msra.mxu1 %v3301_v37 }
 0x227   :  { %2652 = vmatprep.subr.mxu1 %v3095_v0 }
 0x228   :  { %2653 = vmatpush3.msra.mxu1 %v3308_v38 }
 0x229   :  { %2654 = vmatprep.subr.mxu1 %v3095_v0 }
 0x22a   :  { %2655 = vmatpush3.msra.mxu1 %v3315_v39 }
 0x22b   :  { %2670 = vmatprep.subr.mxu1 %v3095_v0 }
 0x2e3   :  { %v488_v31 = vpop.f32.mrf.mxu1 }
 0x2e4   :  { %v492_v33 = vadd.f32 %v488_v31, %v246_v30 }
 0x2e5   :  { %v2642_v34 = vpop.f32.mrf.mxu1 }
 0x2e6   :  { %v500_v35 = vadd.f32 %v2458_v32, %v492_v33 }
 0x2e8   :  { %536 = vst.msk [vmem:[#allocation2] sm:$0xff] %vm535_vm3, %v500_v35  ;;  %2646 = vmatmul.mubr.msk.f32.vlgmr.msra.gmra.mxu0 %vm535_vm3, %v500_v35 }
 0x2e9   :  { %2667 = vmatprep.mubr.msk.f32.mxu0 %vm3096_vm0, %v3095_v0  ;;  %2660 = vmatpush3.msra.mxu0 %v3333_v46 }
 0x2ea   :  { %2661 = vmatprep.subr.mxu0 %v3095_v0 }
 0x2eb   :  { %2662 = vmatpush3.msra.mxu0 %v3338_v47 }
 0x2ec   :  { %2663 = vmatprep.subr.mxu0 %v3095_v0 }
 0x2ed   :  { %2664 = vmatpush3.msra.mxu0 %v3345_v48 }
 0x2ee   :  { %2665 = vmatprep.subr.mxu0 %v3095_v0 }
 0x2ef   :  { %2666 = vmatpush3.msra.mxu0 %v3352_v49 }
 0x2f0   :  { %2675 = vmatprep.subr.mxu0 %v3095_v0 }
 0x3a8   :  { %v606_v41 = vpop.f32.mrf.mxu0 }
 0x3a9   :  { %v617_v42 = vadd.f32 %v3321_v40, %v606_v41  ;;  %v613_v60 = vadd.f32 %v3381_v59, %v606_v41 }
 0x3aa   :  { %v2647_v43 = vpop.f32.mrf.mxu0 }
 0x3ab   :  { %2866 = vtanh.f32 %v617_v42 }
 0x3b8   :  { %v2867_v44 = vpop.eup %2866 }
 0x3b9   :  { %620 = vrot.lane.b32.xlu0 %v2867_v44, %s3098_s1 }
 0x3bd   :  { %773 = vrot.lane.b32.xlu0 %v2462_v55, %s3086_s0 }
 0x42b   :  { %v621_v45 = vpop.permute.xlu0 %620 }
 0x42c   :  { %2657 = vmatmul.mubr.msk.f32.vlgmr.msra.gmra.mxu1 %vm340_vm2, %v621_v45  ;;  %v2473_v45 = vld [vmem:[%s3683_s25 + $0x10] sm:$0xff] }
 0x42d   :  { %2671 = vmatpush3.msra.mxu1 %v3281_v26  ;;  %2672 = vmatprep.mubr.msk.f32.mxu1 %vm3096_vm0, %v3095_v0 }
 0x42e   :  { %2686 = vmatprep.subr.mxu1 %v3095_v0 }
 0x42f   :  { %v3384_v62 = vpop.permute.xlu0 %773 }
 0x4ec   :  { %v690_v51 = vpop.f32.mrf.mxu1 }
 0x4ed   :  { %v691_v52 = vadd.f32 %v3358_v50, %v690_v51 }
 0x4ee   :  { %v2658_v53 = vpop.f32.mrf.mxu1 }
 0x4ef   :  { %2868 = vtanh.f32 %v691_v52 }
 0x4fc   :  { %v2869_v54 = vpop.eup %2868 }
 0x4fd   :  { %2668 = vmatmul.mubr.msk.f32.vlgmr.msra.gmra.mxu0 %vm340_vm2, %v2869_v54 }
 0x4fe   :  { %2676 = vmatpush3.msra.mxu0 %v3296_v36  ;;  %2683 = vmatprep.mubr.msk.f32.mxu0 %vm3096_vm0, %v3095_v0 }
 0x4ff   :  { %2677 = vmatprep.subr.mxu0 %v3095_v0 }
 0x500   :  { %2678 = vmatpush3.msra.mxu0 %v3301_v37 }
 0x501   :  { %2679 = vmatprep.subr.mxu0 %v3095_v0 }
 0x502   :  { %2680 = vmatpush3.msra.mxu0 %v3308_v38 }
 0x503   :  { %2681 = vmatprep.subr.mxu0 %v3095_v0 }
 0x504   :  { %2682 = vmatpush3.msra.mxu0 %v3315_v39 }
 0x505   :  { %2697 = vmatprep.subr.mxu0 %v3095_v0 }
 0x5bd   :  { %v764_v56 = vpop.f32.mrf.mxu0 }
 0x5be   :  { %769 = vrot.lane.b32.xlu1 %v764_v56, %s3086_s0 }
 0x5bf   :  { %v2669_v57 = vpop.f32.mrf.mxu0 }
 0x5c2   :  { %779 = vrot.lane.b32.xlu1 %v777_v58, %s3086_s0 }
 0x630   :  { %v770_v61 = vpop.permute.xlu1 %769 }
 0x631   :  { %v772_v63 = vadd.f32 %v770_v61, %v613_v60 }
 0x633   :  { %v776_v1 = vadd.f32 %v3384_v62, %v772_v63 }
 0x634   :  { %v780_v2 = vpop.permute.xlu1 %779 }
 0x635   :  { %v782_v3 = vmul.f32 %v780_v2, %v776_v1 }
 0x637   :  { %784 = vrot.lane.b32.xlu0 %v782_v3, %s3099_s16 }
 0x6a9   :  { %v785_v4 = vpop.permute.xlu0 %784 }
 0x6aa   :  { %v787_v5 = vadd.f32 %v785_v4, %v782_v3 }
 0x6ac   :  { %789 = vrot.lane.b32.xlu1 %v787_v5, %s3099_s16 }
 0x71e   :  { %v790_v6 = vpop.permute.xlu1 %789 }
 0x71f   :  { %v792_v7 = vadd.f32 %v790_v6, %v606_v41 }
 0x721   :  { %794 = vst.msk [vmem:[#allocation2 + $0x8] sm:$0xff] %vm535_vm3, %v792_v7  ;;  %2673 = vmatmul.mubr.msk.f32.vlgmr.msra.gmra.mxu1 %vm535_vm3, %v792_v7 }
 0x722   :  { %2687 = vmatpush3.msra.mxu1 %v3333_v46  ;;  %2694 = vmatprep.mubr.msk.f32.mxu1 %vm3096_vm0, %v3095_v0 }
 0x723   :  { %2688 = vmatprep.subr.mxu1 %v3095_v0 }
 0x724   :  { %2689 = vmatpush3.msra.mxu1 %v3338_v47 }
 0x725   :  { %2690 = vmatprep.subr.mxu1 %v3095_v0 }
 0x726   :  { %2691 = vmatpush3.msra.mxu1 %v3345_v48 }
 0x727   :  { %2692 = vmatprep.subr.mxu1 %v3095_v0 }
 0x728   :  { %2693 = vmatpush3.msra.mxu1 %v3352_v49 }
 0x729   :  { %2702 = vmatprep.subr.mxu1 %v3095_v0 }
 0x7e1   :  { %v864_v8 = vpop.f32.mrf.mxu1 }
 0x7e2   :  { %v869_v9 = vadd.f32 %v864_v8, %v3321_v40  ;;  %v868_v20 = vadd.f32 %v864_v8, %v3381_v59 }
 0x7e3   :  { %v2674_v10 = vpop.f32.mrf.mxu1 }
 0x7e4   :  { %2870 = vtanh.f32 %v869_v9 }
 0x7f1   :  { %v2871_v11 = vpop.eup %2870 }
 0x7f2   :  { %872 = vrot.lane.b32.xlu0 %v2871_v11, %s3098_s1  ;;  %v2477_v11 = vld [vmem:[%s3683_s25 + $0x18] sm:$0xff] }
 0x7f6   :  { %1029 = vrot.lane.b32.xlu0 %v2469_v17, %s3086_s0 }
 0x864   :  { %v873_v12 = vpop.permute.xlu0 %872 }
 0x865   :  { %2684 = vmatmul.mubr.msk.f32.vlgmr.msra.gmra.mxu0 %vm340_vm2, %v873_v12 }
 0x866   :  { %2698 = vmatpush3.msra.mxu0 %v3281_v26  ;;  %2699 = vmatprep.mubr.msk.f32.mxu0 %vm3096_vm0, %v3095_v0 }
 0x867   :  { %2713 = vmatprep.subr.mxu0 %v3095_v0 }
 0x868   :  { %v1030_v23 = vpop.permute.xlu0 %1029 }
 0x925   :  { %v942_v13 = vpop.f32.mrf.mxu0 }
 0x926   :  { %v943_v14 = vadd.f32 %v3358_v50, %v942_v13 }
 0x927   :  { %v2685_v15 = vpop.f32.mrf.mxu0 }
 0x928   :  { %2872 = vtanh.f32 %v943_v14 }
 0x935   :  { %v2873_v16 = vpop.eup %2872 }
 0x936   :  { %2695 = vmatmul.mubr.msk.f32.vlgmr.msra.gmra.mxu1 %vm340_vm2, %v2873_v16 }
 0x937   :  { %2703 = vmatpush3.msra.mxu1 %v3296_v36  ;;  %2710 = vmatprep.mubr.msk.f32.mxu1 %vm3096_vm0, %v3095_v0 }
 0x938   :  { %2704 = vmatprep.subr.mxu1 %v3095_v0 }
 0x939   :  { %2705 = vmatpush3.msra.mxu1 %v3301_v37 }
 0x93a   :  { %2706 = vmatprep.subr.mxu1 %v3095_v0 }
 0x93b   :  { %2707 = vmatpush3.msra.mxu1 %v3308_v38 }
 0x93c   :  { %2708 = vmatprep.subr.mxu1 %v3095_v0 }
 0x93d   :  { %2709 = vmatpush3.msra.mxu1 %v3315_v39 }
 0x93e   :  { %2724 = vmatprep.subr.mxu1 %v3095_v0 }
 0x9f6   :  { %v1016_v18 = vpop.f32.mrf.mxu1 }
 0x9f7   :  { %1021 = vrot.lane.b32.xlu1 %v1016_v18, %s3086_s0 }
 0x9f8   :  { %v2696_v19 = vpop.f32.mrf.mxu1 }
 0xa69   :  { %v1022_v21 = vpop.permute.xlu1 %1021 }
 0xa6a   :  { %v1024_v22 = vadd.f32 %v1022_v21, %v868_v20 }
 0xa6c   :  { %v1025_v24 = vadd.f32 %v1024_v22, %v3384_v62 }
 0xa6e   :  { %v1032_v25 = vmul.f32 %v1030_v23, %v1025_v24 }
 0xa70   :  { %1034 = vrot.lane.b32.xlu1 %v1032_v25, %s3099_s16 }
 0xae2   :  { %v1035_v27 = vpop.permute.xlu1 %1034 }
 0xae3   :  { %v1037_v28 = vadd.f32 %v1035_v27, %v1032_v25 }
 0xae5   :  { %1039 = vrot.lane.b32.xlu0 %v1037_v28, %s3099_s16 }
 0xb57   :  { %v1040_v29 = vpop.permute.xlu0 %1039 }
 0xb58   :  { %v1042_v30 = vadd.f32 %v1040_v29, %v864_v8 }
 0xb5a   :  { %1044 = vst.msk [vmem:[#allocation2 + $0x10] sm:$0xff] %vm535_vm3, %v1042_v30  ;;  %2700 = vmatmul.mubr.msk.f32.vlgmr.msra.gmra.mxu0 %vm535_vm3, %v1042_v30 }
 0xb5b   :  { %2714 = vmatpush3.msra.mxu0 %v3333_v46  ;;  %2721 = vmatprep.mubr.msk.f32.mxu0 %vm3096_vm0, %v3095_v0 }
 0xb5c   :  { %2715 = vmatprep.subr.mxu0 %v3095_v0 }
 0xb5d   :  { %2716 = vmatpush3.msra.mxu0 %v3338_v47 }
 0xb5e   :  { %2717 = vmatprep.subr.mxu0 %v3095_v0 }
 0xb5f   :  { %2718 = vmatpush3.msra.mxu0 %v3345_v48 }
 0xb60   :  { %2719 = vmatprep.subr.mxu0 %v3095_v0 }
 0xb61   :  { %2720 = vmatpush3.msra.mxu0 %v3352_v49 }
 0xb62   :  { %2729 = vmatprep.subr.mxu0 %v3095_v0 }
 0xc1a   :  { %v1114_v31 = vpop.f32.mrf.mxu0 }
 0xc1b   :  { %v1119_v32 = vadd.f32 %v1114_v31, %v3321_v40  ;;  %v1118_v53 = vadd.f32 %v1114_v31, %v3381_v59 }
 0xc1c   :  { %v2701_v33 = vpop.f32.mrf.mxu0 }
 0xc1d   :  { %2874 = vtanh.f32 %v1119_v32 }
 0xc2a   :  { %v2875_v34 = vpop.eup %2874 }
 0xc2b   :  { %1122 = vrot.lane.b32.xlu1 %v2875_v34, %s3098_s1  ;;  %v2481_v34 = vld [vmem:[%s3683_s25 + $0x20] sm:$0xff] }
 0xc2f   :  { %1279 = vrot.lane.b32.xlu1 %v2473_v45, %s3086_s0 }
 0xc9d   :  { %v1123_v35 = vpop.permute.xlu1 %1122 }
 0xc9e   :  { %2711 = vmatmul.mubr.msk.f32.vlgmr.msra.gmra.mxu1 %vm340_vm2, %v1123_v35 }
 0xc9f   :  { %2725 = vmatpush3.msra.mxu1 %v3281_v26  ;;  %2726 = vmatprep.mubr.msk.f32.mxu1 %vm3096_vm0, %v3095_v0 }
 0xca0   :  { %2740 = vmatprep.subr.mxu1 %v3095_v0 }
 0xca1   :  { %v1280_v56 = vpop.permute.xlu1 %1279 }
 0xd5e   :  { %v1192_v41 = vpop.f32.mrf.mxu1 }
 0xd5f   :  { %v1193_v42 = vadd.f32 %v3358_v50, %v1192_v41 }
 0xd60   :  { %v2712_v43 = vpop.f32.mrf.mxu1 }
 0xd61   :  { %2876 = vtanh.f32 %v1193_v42 }
 0xd6e   :  { %v2877_v44 = vpop.eup %2876 }
 0xd6f   :  { %2722 = vmatmul.mubr.msk.f32.vlgmr.msra.gmra.mxu0 %vm340_vm2, %v2877_v44 }
 0xd70   :  { %2730 = vmatpush3.msra.mxu0 %v3296_v36  ;;  %2737 = vmatprep.mubr.msk.f32.mxu0 %vm3096_vm0, %v3095_v0 }
 0xd71   :  { %2731 = vmatprep.subr.mxu0 %v3095_v0 }
 0xd72   :  { %2732 = vmatpush3.msra.mxu0 %v3301_v37 }
 0xd73   :  { %2733 = vmatprep.subr.mxu0 %v3095_v0 }
 0xd74   :  { %2734 = vmatpush3.msra.mxu0 %v3308_v38 }
 0xd75   :  { %2735 = vmatprep.subr.mxu0 %v3095_v0 }
 0xd76   :  { %2736 = vmatpush3.msra.mxu0 %v3315_v39 }
 0xd77   :  { %2751 = vmatprep.subr.mxu0 %v3095_v0 }
 0xe2f   :  { %v1266_v51 = vpop.f32.mrf.mxu0 }
 0xe30   :  { %1271 = vrot.lane.b32.xlu0 %v1266_v51, %s3086_s0 }
 0xe31   :  { %v2723_v52 = vpop.f32.mrf.mxu0 }
 0xea2   :  { %v1272_v54 = vpop.permute.xlu0 %1271 }
 0xea3   :  { %v1274_v55 = vadd.f32 %v1272_v54, %v1118_v53 }
 0xea5   :  { %v1275_v57 = vadd.f32 %v1274_v55, %v3384_v62 }
 0xea7   :  { %v1282_v58 = vmul.f32 %v1280_v56, %v1275_v57 }
 0xea9   :  { %1284 = vrot.lane.b32.xlu0 %v1282_v58, %s3099_s16 }
 0xf1b   :  { %v1285_v60 = vpop.permute.xlu0 %1284 }
 0xf1c   :  { %v1287_v61 = vadd.f32 %v1285_v60, %v1282_v58 }
 0xf1e   :  { %1289 = vrot.lane.b32.xlu1 %v1287_v61, %s3099_s16 }
 0xf90   :  { %v1290_v63 = vpop.permute.xlu1 %1289 }
 0xf91   :  { %v1292_v1 = vadd.f32 %v1290_v63, %v1114_v31 }
 0xf93   :  { %1294 = vst.msk [vmem:[#allocation2 + $0x18] sm:$0xff] %vm535_vm3, %v1292_v1  ;;  %2727 = vmatmul.mubr.msk.f32.vlgmr.msra.gmra.mxu1 %vm535_vm3, %v1292_v1 }
 0xf94   :  { %2741 = vmatpush3.msra.mxu1 %v3333_v46  ;;  %2748 = vmatprep.mubr.msk.f32.mxu1 %vm3096_vm0, %v3095_v0 }
 0xf95   :  { %2742 = vmatprep.subr.mxu1 %v3095_v0 }
 0xf96   :  { %2743 = vmatpush3.msra.mxu1 %v3338_v47 }
 0xf97   :  { %2744 = vmatprep.subr.mxu1 %v3095_v0 }
 0xf98   :  { %2745 = vmatpush3.msra.mxu1 %v3345_v48 }
 0xf99   :  { %2746 = vmatprep.subr.mxu1 %v3095_v0 }
 0xf9a   :  { %2747 = vmatpush3.msra.mxu1 %v3352_v49 }
 0xf9b   :  { %2756 = vmatprep.subr.mxu1 %v3095_v0 }
0x1053   :  { %v1364_v2 = vpop.f32.mrf.mxu1 }
0x1054   :  { %v1369_v3 = vadd.f32 %v1364_v2, %v3321_v40  ;;  %v1368_v14 = vadd.f32 %v1364_v2, %v3381_v59 }
0x1055   :  { %v2728_v4 = vpop.f32.mrf.mxu1 }
0x1056   :  { %2878 = vtanh.f32 %v1369_v3 }
0x1063   :  { %v2879_v5 = vpop.eup %2878 }
0x1064   :  { %1372 = vrot.lane.b32.xlu0 %v2879_v5, %s3098_s1 }
0x1068   :  { %1529 = vrot.lane.b32.xlu0 %v2477_v11, %s3086_s0 }
0x10d6   :  { %v1373_v6 = vpop.permute.xlu0 %1372 }
0x10d7   :  { %2738 = vmatmul.mubr.msk.f32.vlgmr.msra.gmra.mxu0 %vm340_vm2, %v1373_v6 }
0x10d8   :  { %2752 = vmatpush3.msra.mxu0 %v3281_v26  ;;  %2753 = vmatprep.mubr.msk.f32.mxu0 %vm3096_vm0, %v3095_v0 }
0x10d9   :  { %2767 = vmatprep.subr.mxu0 %v3095_v0 }
0x10da   :  { %v1530_v17 = vpop.permute.xlu0 %1529 }
0x1197   :  { %v1442_v7 = vpop.f32.mrf.mxu0 }
0x1198   :  { %v1443_v8 = vadd.f32 %v3358_v50, %v1442_v7 }
0x1199   :  { %v2739_v9 = vpop.f32.mrf.mxu0 }
0x119a   :  { %2880 = vtanh.f32 %v1443_v8 }
0x11a7   :  { %v2881_v10 = vpop.eup %2880 }
0x11a8   :  { %2749 = vmatmul.mubr.msk.f32.vlgmr.msra.gmra.mxu1 %vm340_vm2, %v2881_v10 }
0x11a9   :  { %2757 = vmatpush3.msra.mxu1 %v3296_v36  ;;  %2764 = vmatprep.mubr.msk.f32.mxu1 %vm3096_vm0, %v3095_v0 }
0x11aa   :  { %2758 = vmatprep.subr.mxu1 %v3095_v0 }
0x11ab   :  { %2759 = vmatpush3.msra.mxu1 %v3301_v37 }
0x11ac   :  { %2760 = vmatprep.subr.mxu1 %v3095_v0 }
0x11ad   :  { %2761 = vmatpush3.msra.mxu1 %v3308_v38 }
0x11ae   :  { %2762 = vmatprep.subr.mxu1 %v3095_v0 }
0x11af   :  { %2763 = vmatpush3.msra.mxu1 %v3315_v39 }
0x11b0   :  { %2778 = vmatprep.subr.mxu1 %v3095_v0 }
0x1268   :  { %v1516_v12 = vpop.f32.mrf.mxu1 }
0x1269   :  { %1521 = vrot.lane.b32.xlu1 %v1516_v12, %s3086_s0 }
0x126a   :  { %v2750_v13 = vpop.f32.mrf.mxu1 }
0x12db   :  { %v1522_v15 = vpop.permute.xlu1 %1521 }
0x12dc   :  { %v1524_v16 = vadd.f32 %v1522_v15, %v1368_v14 }
0x12de   :  { %v1525_v18 = vadd.f32 %v1524_v16, %v3384_v62 }
0x12e0   :  { %v1532_v19 = vmul.f32 %v1530_v17, %v1525_v18 }
0x12e2   :  { %1534 = vrot.lane.b32.xlu1 %v1532_v19, %s3099_s16 }
0x1354   :  { %v1535_v20 = vpop.permute.xlu1 %1534 }
0x1355   :  { %v1537_v21 = vadd.f32 %v1535_v20, %v1532_v19 }
0x1357   :  { %1539 = vrot.lane.b32.xlu0 %v1537_v21, %s3099_s16 }
0x13c9   :  { %v1540_v22 = vpop.permute.xlu0 %1539 }
0x13ca   :  { %v1542_v23 = vadd.f32 %v1540_v22, %v1364_v2 }
0x13cc   :  { %1544 = vst.msk [vmem:[#allocation2 + $0x20] sm:$0xff] %vm535_vm3, %v1542_v23  ;;  %2754 = vmatmul.mubr.msk.f32.vlgmr.msra.gmra.mxu0 %vm535_vm3, %v1542_v23 }
0x13cd   :  { %2768 = vmatpush3.msra.mxu0 %v3333_v46  ;;  %2775 = vmatprep.mubr.msk.f32.mxu0 %vm3096_vm0, %v3095_v0 }
0x13ce   :  { %2769 = vmatprep.subr.mxu0 %v3095_v0 }
0x13cf   :  { %2770 = vmatpush3.msra.mxu0 %v3338_v47 }
0x13d0   :  { %2771 = vmatprep.subr.mxu0 %v3095_v0 }
0x13d1   :  { %2772 = vmatpush3.msra.mxu0 %v3345_v48 }
0x13d2   :  { %2773 = vmatprep.subr.mxu0 %v3095_v0 }
0x13d3   :  { %2774 = vmatpush3.msra.mxu0 %v3352_v49  ;;  %v2299_v17 = vld [vmem:[#allocation2 + $0x20] sm:$0xff] }
0x13d4   :  { %2783 = vmatprep.subr.mxu0 %v3095_v0 }
0x148c   :  { %v1614_v24 = vpop.f32.mrf.mxu0 }
0x148d   :  { %v1619_v25 = vadd.f32 %v1614_v24, %v3321_v40  ;;  %v1618_v42 = vadd.f32 %v1614_v24, %v3381_v59 }
0x148e   :  { %v2755_v27 = vpop.f32.mrf.mxu0 }
0x148f   :  { %2882 = vtanh.f32 %v1619_v25 }
0x149c   :  { %v2883_v28 = vpop.eup %2882 }
0x149d   :  { %1622 = vrot.lane.b32.xlu1 %v2883_v28, %s3098_s1 }
0x14a1   :  { %1779 = vrot.lane.b32.xlu1 %v2481_v34, %s3086_s0 }
0x150f   :  { %v1623_v29 = vpop.permute.xlu1 %1622 }
0x1510   :  { %2765 = vmatmul.mubr.msk.f32.vlgmr.msra.gmra.mxu1 %vm340_vm2, %v1623_v29 }
0x1511   :  { %2779 = vmatpush3.msra.mxu1 %v3281_v26  ;;  %2780 = vmatprep.mubr.msk.f32.mxu1 %vm3096_vm0, %v3095_v0 }
0x1512   :  { %2794 = vmatprep.subr.mxu1 %v3095_v0 }
0x1513   :  { %v1780_v45 = vpop.permute.xlu1 %1779 }
0x15d0   :  { %v1692_v30 = vpop.f32.mrf.mxu1 }
0x15d1   :  { %v1693_v31 = vadd.f32 %v3358_v50, %v1692_v30  ;;  %v2489_v30 = vld [vmem:[%s3683_s25 + $0x30] sm:$0xff] }
0x15d2   :  { %v2766_v32 = vpop.f32.mrf.mxu1 }
0x15d3   :  { %2884 = vtanh.f32 %v1693_v31 }
0x15e0   :  { %v2885_v33 = vpop.eup %2884 }
0x15e1   :  { %2776 = vmatmul.mubr.msk.f32.vlgmr.msra.gmra.mxu0 %vm340_vm2, %v2885_v33 }
0x15e2   :  { %2784 = vmatpush3.msra.mxu0 %v3296_v36  ;;  %2791 = vmatprep.mubr.msk.f32.mxu0 %vm3096_vm0, %v3095_v0 }
0x15e3   :  { %2785 = vmatprep.subr.mxu0 %v3095_v0 }
0x15e4   :  { %2786 = vmatpush3.msra.mxu0 %v3301_v37 }
0x15e5   :  { %2787 = vmatprep.subr.mxu0 %v3095_v0 }
0x15e6   :  { %2788 = vmatpush3.msra.mxu0 %v3308_v38 }
0x15e7   :  { %2789 = vmatprep.subr.mxu0 %v3095_v0 }
0x15e8   :  { %2790 = vmatpush3.msra.mxu0 %v3315_v39 }
0x15e9   :  { %2805 = vmatprep.subr.mxu0 %v3095_v0 }
0x16a1   :  { %v1766_v35 = vpop.f32.mrf.mxu0 }
0x16a2   :  { %1771 = vrot.lane.b32.xlu0 %v1766_v35, %s3086_s0 }
0x16a3   :  { %v2777_v41 = vpop.f32.mrf.mxu0 }
0x1714   :  { %v1772_v43 = vpop.permute.xlu0 %1771 }
0x1715   :  { %v1774_v44 = vadd.f32 %v1772_v43, %v1618_v42 }
0x1717   :  { %v1775_v51 = vadd.f32 %v1774_v44, %v3384_v62 }
0x1719   :  { %v1782_v52 = vmul.f32 %v1780_v45, %v1775_v51 }
0x171b   :  { %1784 = vrot.lane.b32.xlu0 %v1782_v52, %s3099_s16 }
0x178d   :  { %v1785_v53 = vpop.permute.xlu0 %1784 }
0x178e   :  { %v1787_v54 = vadd.f32 %v1785_v53, %v1782_v52 }
0x1790   :  { %1789 = vrot.lane.b32.xlu1 %v1787_v54, %s3099_s16 }
0x1802   :  { %v1790_v55 = vpop.permute.xlu1 %1789 }
0x1803   :  { %v1792_v56 = vadd.f32 %v1790_v55, %v1614_v24 }
0x1805   :  { %1794 = vst.msk [vmem:[#allocation2 + $0x28] sm:$0xff] %vm535_vm3, %v1792_v56  ;;  %2781 = vmatmul.mubr.msk.f32.vlgmr.msra.gmra.mxu1 %vm535_vm3, %v1792_v56 }
0x1806   :  { %2795 = vmatpush3.msra.mxu1 %v3333_v46  ;;  %2802 = vmatprep.mubr.msk.f32.mxu1 %vm3096_vm0, %v3095_v0 }
0x1807   :  { %2796 = vmatprep.subr.mxu1 %v3095_v0 }
0x1808   :  { %2797 = vmatpush3.msra.mxu1 %v3338_v47 }
0x1809   :  { %2798 = vmatprep.subr.mxu1 %v3095_v0 }
0x180a   :  { %2799 = vmatpush3.msra.mxu1 %v3345_v48 }
0x180b   :  { %2800 = vmatprep.subr.mxu1 %v3095_v0 }
0x180c   :  { %2801 = vmatpush3.msra.mxu1 %v3352_v49  ;;  %v2300_v18 = vld [vmem:[#allocation2 + $0x28] sm:$0xff] }
0x180d   :  { %2810 = vmatprep.subr.mxu1 %v3095_v0 }
0x18c5   :  { %v1864_v57 = vpop.f32.mrf.mxu1 }
0x18c6   :  { %v1869_v58 = vadd.f32 %v1864_v57, %v3321_v40 }
0x18c7   :  { %v2782_v60 = vpop.f32.mrf.mxu1 }
0x18c8   :  { %2886 = vtanh.f32 %v1869_v58 }
0x18d5   :  { %v2887_v61 = vpop.eup %2886 }
0x18d6   :  { %1872 = vrot.lane.b32.xlu0 %v2887_v61, %s3098_s1 }
0x1948   :  { %v1873_v63 = vpop.permute.xlu0 %1872 }
0x1949   :  { %2792 = vmatmul.mubr.msk.f32.vlgmr.msra.gmra.mxu0 %vm340_vm2, %v1873_v63 }
0x194a   :  { %2806 = vmatpush3.msra.mxu0 %v3281_v26  ;;  %2807 = vmatprep.mubr.msk.f32.mxu0 %vm3096_vm0, %v3095_v0  ;;  %v2485_v26 = vld [vmem:[%s3683_s25 + $0x28] sm:$0xff] }
0x194b   :  { %2821 = vmatprep.subr.mxu0 %v3095_v0  ;;  %2029 = vrot.lane.b32.xlu0 %v2485_v26, %s3086_s0 }
0x19bd   :  { %v2030_v8 = vpop.permute.xlu0 %2029 }
0x1a09   :  { %v1942_v1 = vpop.f32.mrf.mxu0 }
0x1a0a   :  { %v1943_v2 = vadd.f32 %v3358_v50, %v1942_v1 }
0x1a0b   :  { %v2793_v3 = vpop.f32.mrf.mxu0 }
0x1a0c   :  { %2888 = vtanh.f32 %v1943_v2 }
0x1a19   :  { %v2889_v4 = vpop.eup %2888 }
0x1a1a   :  { %2803 = vmatmul.mubr.msk.f32.vlgmr.msra.gmra.mxu1 %vm340_vm2, %v2889_v4 }
0x1a1b   :  { %2811 = vmatpush3.msra.mxu1 %v3296_v36  ;;  %2818 = vmatprep.mubr.msk.f32.mxu1 %vm3096_vm0, %v3095_v0 }
0x1a1c   :  { %2812 = vmatprep.subr.mxu1 %v3095_v0 }
0x1a1d   :  { %2813 = vmatpush3.msra.mxu1 %v3301_v37  ;;  %v1868_v37 = vadd.f32 %v1864_v57, %v3381_v59 }
0x1a1e   :  { %2814 = vmatprep.subr.mxu1 %v3095_v0 }
0x1a1f   :  { %2815 = vmatpush3.msra.mxu1 %v3308_v38 }
0x1a20   :  { %2816 = vmatprep.subr.mxu1 %v3095_v0 }
0x1a21   :  { %2817 = vmatpush3.msra.mxu1 %v3315_v39 }
0x1ada   :  { %v2016_v36 = vpop.f32.mrf.mxu1 }
0x1adb   :  { %2021 = vrot.lane.b32.xlu1 %v2016_v36, %s3086_s0 }
0x1adc   :  { %v2804_v5 = vpop.f32.mrf.mxu1 }
0x1b4d   :  { %v2022_v6 = vpop.permute.xlu1 %2021 }
0x1b4e   :  { %v2024_v7 = vadd.f32 %v2022_v6, %v1868_v37 }
0x1b50   :  { %v2025_v38 = vadd.f32 %v2024_v7, %v3384_v62 }
0x1b52   :  { %v2032_v9 = vmul.f32 %v2030_v8, %v2025_v38 }
0x1b54   :  { %2034 = vrot.lane.b32.xlu1 %v2032_v9, %s3099_s16 }
0x1bc6   :  { %v2035_v39 = vpop.permute.xlu1 %2034 }
0x1bc7   :  { %v2037_v10 = vadd.f32 %v2035_v39, %v2032_v9 }
0x1bc9   :  { %2039 = vrot.lane.b32.xlu0 %v2037_v10, %s3099_s16 }
0x1c3b   :  { %v2040_v11 = vpop.permute.xlu0 %2039 }
0x1c3c   :  { %v2042_v12 = vadd.f32 %v2040_v11, %v1864_v57 }
0x1c3e   :  { %2044 = vst.msk [vmem:[#allocation2 + $0x30] sm:$0xff] %vm535_vm3, %v2042_v12  ;;  %2808 = vmatmul.mubr.msk.f32.vlgmr.msra.gmra.mxu0 %vm535_vm3, %v2042_v12 }
0x1c3f   :  { %2822 = vmatpush3.msra.mxu0 %v3333_v46  ;;  %2829 = vmatprep.mubr.msk.f32.mxu0 %vm3096_vm0, %v3095_v0  ;;  %v2303_v46 = vld [vmem:[%s3674_s17] sm:$0xff] }
0x1c40   :  { %2823 = vmatprep.subr.mxu0 %v3095_v0  ;;  %2832 = vmatprep.subr.mxu1 %v2303_v46 }
0x1c41   :  { %2824 = vmatpush3.msra.mxu0 %v3338_v47 }
0x1c42   :  { %2825 = vmatprep.subr.mxu0 %v3095_v0 }
0x1c43   :  { %2826 = vmatpush3.msra.mxu0 %v3345_v48  ;;  %v2295_v48 = vld [vmem:[#allocation2] sm:$0xff] }
0x1c44   :  { %2827 = vmatprep.subr.mxu0 %v3095_v0  ;;  %v2296_v0 = vld [vmem:[#allocation2 + $0x8] sm:$0xff] }
0x1c45   :  { %2828 = vmatpush3.msra.mxu0 %v3352_v49  ;;  %v2298_v49 = vld [vmem:[#allocation2 + $0x18] sm:$0xff]  ;;  %v2301_v19 = vld [vmem:[#allocation2 + $0x30] sm:$0xff] }
0x1cfe   :  { %v2114_v13 = vpop.f32.mrf.mxu0 }
0x1cff   :  { %v2119_v14 = vadd.f32 %v2114_v13, %v3321_v40  ;;  %v2297_v40 = vld [vmem:[#allocation2 + $0x10] sm:$0xff]  ;;  %v2118_v33 = vadd.f32 %v2114_v13, %v3381_v59 }
0x1d00   :  { %v2809_v15 = vpop.f32.mrf.mxu0 }
0x1d01   :  { %2890 = vtanh.f32 %v2119_v14 }
0x1d0e   :  { %v2891_v16 = vpop.eup %2890 }
0x1d0f   :  { %2122 = vrot.lane.b32.xlu1 %v2891_v16, %s3098_s1 }
0x1d13   :  { %2279 = vrot.lane.b32.xlu1 %v2489_v30, %s3086_s0 }
0x1d81   :  { %v2123_v47 = vpop.permute.xlu1 %2122 }
0x1d82   :  { %2819 = vmatmul.mubr.msk.f32.vlgmr.msra.gmra.mxu1 %vm340_vm2, %v2123_v47 }
0x1d83   :  { %2834 = vmatprep.mubr.msk.f32.mxu1 %vm535_vm3, %v2295_v48  ;;  %2833 = vmatpush3.msra.mxu1 %v2303_v46 }
0x1d85   :  { %v2280_v41 = vpop.permute.xlu1 %2279 }
0x1d86   :  { %2835 = vmatmul.mubr.msk.f32.vlgmr.msra.gmra.mxu1 %vm535_vm3, %v2296_v0 }
0x1d87   :  { %2837 = vmatprep.mubr.msk.f32.mxu1 %vm535_vm3, %v2297_v40 }
0x1d8a   :  { %2838 = vmatmul.mubr.msk.f32.gmra.mxu1 %vm535_vm3, %v2298_v49 }
0x1d8b   :  { %2840 = vmatprep.mubr.msk.f32.mxu1 %vm535_vm3, %v2299_v17 }
0x1d8e   :  { %2841 = vmatmul.mubr.msk.f32.gmra.mxu1 %vm535_vm3, %v2300_v18 }
0x1d8f   :  { %2843 = vmatprep.mubr.msk.f32.mxu1 %vm535_vm3, %v2301_v19 }
0x1e42   :  { %v2192_v20 = vpop.f32.mrf.mxu1 }
0x1e43   :  { %v2193_v21 = vadd.f32 %v3358_v50, %v2192_v20 }
0x1e44   :  { %v2820_v22 = vpop.f32.mrf.mxu1 }
0x1e45   :  { %2892 = vtanh.f32 %v2193_v21 }
0x1e46   :  { %v2836_v23 = vpop.f32.mrf.mxu1 }
0x1e47   :  { %2435 = vst.msk [vmem:[%s3675_s18 + $0x8] sm:$0xff] %vm2433_vm4, %v2836_v23 }
0x1e48   :  { %v2394_v24 = vpop.f32.mrf.mxu1 }
0x1e49   :  { %2434 = vst.msk [vmem:[%s3675_s18] sm:$0xff] %vm2433_vm4, %v2394_v24 }
0x1e4a   :  { %v2839_v25 = vpop.f32.mrf.mxu1 }
0x1e4b   :  { %2437 = vst.msk [vmem:[%s3675_s18 + $0x18] sm:$0xff] %vm2433_vm4, %v2839_v25 }
0x1e4c   :  { %v2404_v50 = vpop.f32.mrf.mxu1 }
0x1e4d   :  { %2436 = vst.msk [vmem:[%s3675_s18 + $0x10] sm:$0xff] %vm2433_vm4, %v2404_v50 }
0x1e4e   :  { %v2842_v27 = vpop.f32.mrf.mxu1 }
0x1e4f   :  { %2439 = vst.msk [vmem:[%s3675_s18 + $0x28] sm:$0xff] %vm2433_vm4, %v2842_v27 }
0x1e50   :  { %v2414_v28 = vpop.f32.mrf.mxu1 }
0x1e51   :  { %2438 = vst.msk [vmem:[%s3675_s18 + $0x20] sm:$0xff] %vm2433_vm4, %v2414_v28 }
0x1e52   :  { %v2893_v29 = vpop.eup %2892 }
0x1e53   :  { %2830 = vmatmul.mubr.msk.f32.vlgmr.msra.gmra.mxu0 %vm340_vm2, %v2893_v29 }
0x1f13   :  { %v2266_v31 = vpop.f32.mrf.mxu0 }
0x1f14   :  { %2271 = vrot.lane.b32.xlu0 %v2266_v31, %s3086_s0 }
0x1f15   :  { %v2831_v32 = vpop.f32.mrf.mxu0 }
0x1f86   :  { %v2272_v34 = vpop.permute.xlu0 %2271 }
0x1f87   :  { %v2274_v35 = vadd.f32 %v2272_v34, %v2118_v33 }
0x1f89   :  { %v2275_v42 = vadd.f32 %v2274_v35, %v3384_v62 }
0x1f8b   :  { %v2282_v43 = vmul.f32 %v2280_v41, %v2275_v42 }
0x1f8d   :  { %2284 = vrot.lane.b32.xlu0 %v2282_v43, %s3099_s16 }
0x1fff   :  { %v2285_v44 = vpop.permute.xlu0 %2284 }
0x2000   :  { %v2287_v45 = vadd.f32 %v2285_v44, %v2282_v43 }
0x2002   :  { %2289 = vrot.lane.b32.xlu1 %v2287_v45, %s3099_s16 }
0x2074   :  { %v2290_v51 = vpop.permute.xlu1 %2289 }
0x2075   :  { %v2292_v52 = vadd.f32 %v2290_v51, %v2114_v13 }
0x2077   :  { %2294 = vst.msk [vmem:[#allocation2 + $0x38] sm:$0xff] %vm535_vm3, %v2292_v52 }
0x207e   :  { %v2302_v53 = vld [vmem:[#allocation2 + $0x38] sm:$0xff] }
0x207f   :  { %2844 = vmatmul.mubr.msk.f32.gmra.mxu1 %vm535_vm3, %v2302_v53 }
0x213f   :  { %v2845_v59 = vpop.f32.mrf.mxu1 }
0x2140   :  { %2441 = vst.msk [vmem:[%s3675_s18 + $0x38] sm:$0xff] %vm2433_vm4, %v2845_v59 }
0x2141   :  { %v2424_v62 = vpop.f32.mrf.mxu1 }
0x2142   :  { %2440 = vst.msk [vmem:[%s3675_s18 + $0x30] sm:$0xff] %vm2433_vm4, %v2424_v62 }
0x2143   :  { %2446 = vsyncpa [#allocation4], 1 }
0x2144   :  { %2447 = vsyncpa [#allocation6], 1 }
0x2145   :  { %2448 = vsyncpa [#allocation9], 1 }
0x2146   :  { %2449 = vsyncpa [#allocation12], 1 }
0x2147   :  { %2450 = vsyncpa [#allocation15], 1 }

</bundles_post_ra>
